<compile_context>
chip_gen: v5e
topology: v5e:2x2
jax: 0.10.0
libtpu: 0.0.40
codegen_flags: <defaults>
</compile_context>

<pallas_src>
import functools

import jax
import jax.numpy as jnp
from jax.experimental import pallas as pl
from jax.experimental.pallas import tpu as pltpu


_PO = 8  # sublane-aligned column offset of the interior inside the padded plane


# ----------------------------------------------------------------------------
# Utilities
# ----------------------------------------------------------------------------
def _silu(y):
    # exp lands on the EUP; the denominator reciprocal is lowered through
    # pl.reciprocal.  TODO(synk): approx=True once not DMA/store bound
    # (re-validate tolerances).
    return y * pl.reciprocal(1.0 + jnp.exp(-y), approx=False)


@functools.lru_cache(maxsize=None)
def _vmem_limit_bytes():
    """Generation-aware VMEM budget (~3/4 of per-core physical capacity)."""
    try:
        cap = int(pltpu.get_tpu_info().vmem_capacity_bytes)
    except Exception:
        cap = 64 * 1024 * 1024  # v7x floor
    return (3 * cap) // 4


def _row_tile(h, w, c, itemsize, target_bytes):
    """Largest divisor of h whose (th, w, c) block stays under target_bytes."""
    best = 1
    for th in range(1, h + 1):
        if h % th == 0 and th * w * c * itemsize <= target_bytes:
            best = th
    return best


# ----------------------------------------------------------------------------
# Kernels
# ----------------------------------------------------------------------------
def _stem_kernel(x_ref, w1_ref, s1_ref, b1_ref, w2_ref, s2_ref, b2_ref,
                 y1_ref, y2_ref, *, T):
    # x_ref: (1, TH, W, Cin); w*: (Cin, mid); s*/b*: (1, mid)
    cin = x_ref.shape[-1]
    x = x_ref[0].reshape(T, cin)                       # native dtype -> MXU

    a = jnp.dot(x, w1_ref[...], preferred_element_type=jnp.float32)
    a = a * s1_ref[...] + b1_ref[...]
    y1_ref[0] = _silu(a).reshape(y1_ref.shape[1:]).astype(y1_ref.dtype)

    c = jnp.dot(x, w2_ref[...], preferred_element_type=jnp.float32)
    c = c * s2_ref[...] + b2_ref[...]
    y2_ref[0] = _silu(c).reshape(y2_ref.shape[1:]).astype(y2_ref.dtype)


def _residual_unit_kernel(y_ref, ytop_ref, ybot_ref, wa_ref, sa_ref, ba_ref,
                          wb_ref, sb_ref, bb_ref, o_ref, pad_ref, pln_ref,
                          *, TH, W, add):
    # y_ref: (1, TH, W, C) row tile; ytop/ybot: (1, 1, W, C) halo rows.
    # wa: (C, C); wb: (9, C, C) taps in (dy, dx) row-major order.
    # pad_ref : (TH+2, W+16, C) halo-extended intermediate, interior at col _PO.
    # pln_ref : (3, TH+2, W, C) three column-shifted planes (dx = -1, 0, +1).
    C = y_ref.shape[-1]
    dt = pad_ref.dtype
    t_idx = pl.program_id(1)
    last_t = pl.num_programs(1) - 1

    yf = y_ref[0].reshape(TH * W, C)

    def conv1x1(xm):
        a = jnp.dot(xm, wa_ref[...], preferred_element_type=jnp.float32)
        return _silu(a * sa_ref[...] + ba_ref[...])

    # Residual-unit 1x1 Conv+BN+SiLU on the tile rows and on both halo rows.
    # Halo rows outside the image become the 3x3 conv's zero padding.
    t_main = conv1x1(yf)                                       # (TH*W, C) f32
    t_top = jnp.where(t_idx == 0, 0.0, conv1x1(ytop_ref[0, 0]))
    t_bot = jnp.where(t_idx == last_t, 0.0, conv1x1(ybot_ref[0, 0]))

    # Zero ONLY the two 8-wide column strips flanking the interior (the halo
    # columns the shifted taps read) -- not the whole scratch -- then store the
    # halo-extended rows at the sublane-aligned column offset _PO.
    zstrip = jnp.zeros((TH + 2, 8, C), dt)
    r0 = ((_PO + W) // 8) * 8
    pad_ref[:, 0:8, :] = zstrip
    pad_ref[:, r0:r0 + 8, :] = zstrip
    pad_ref[0, _PO:_PO + W, :] = t_top.astype(dt)
    pad_ref[1:TH + 1, _PO:_PO + W, :] = t_main.reshape(TH, W, C).astype(dt)
    pad_ref[TH + 1, _PO:_PO + W, :] = t_bot.astype(dt)

    # Materialize the three column shifts once.  Only these 3 window reads pay
    # a relayout; the 9 tap reads below are plain leading-dim slices whose
    # reshape is free (vs 9 misaligned slice+copy patches before).
    for dx in range(3):
        off = _PO - 1 + dx
        pln_ref[dx] = pad_ref[:, off:off + W, :]

    # 3x3 conv (stride 1, pad 1): 9 shifted-tap matmuls into one f32 accumulator.
    acc = jnp.zeros((TH * W, C), jnp.float32)
    for dy in range(3):
        for dx in range(3):
            patch = pln_ref[dx, dy:dy + TH, :, :].reshape(TH * W, C)
            acc = acc + jnp.dot(patch, wb_ref[3 * dy + dx],
                                preferred_element_type=jnp.float32)

    z = _silu(acc * sb_ref[...] + bb_ref[...])
    if add:
        z = z + yf.astype(jnp.float32)
    o_ref[0] = z.reshape(TH, W, C).astype(o_ref.dtype)


def _head_kernel(y1_ref, y2_ref, wa_ref, wb_ref, s_ref, b_ref, o_ref, *, T):
    # Concat-free conv3: silu(bn(y1 @ W3[:mid] + y2 @ W3[mid:]))
    c = y1_ref.shape[-1]
    acc = jnp.dot(y1_ref[0].reshape(T, c), wa_ref[...],
                  preferred_element_type=jnp.float32)
    acc = acc + jnp.dot(y2_ref[0].reshape(T, c), wb_ref[...],
                        preferred_element_type=jnp.float32)
    acc = _silu(acc * s_ref[...] + b_ref[...])
    o_ref[0] = acc.reshape(o_ref.shape[1:]).astype(o_ref.dtype)


# ----------------------------------------------------------------------------
# Wrappers (pallas_call plumbing)
# ----------------------------------------------------------------------------
def csp_stem(x, w1, s1, b1, w2, s2, b2):
    """Fused conv1 + conv2 (1x1). x: (N,H,W,Cin) -> (y1, y2), each (N,H,W,mid)."""
    N, H, W, Cin = x.shape
    mid = w1.shape[-1]
    isz = jnp.dtype(x.dtype).itemsize
    vmem = _vmem_limit_bytes()
    # 1x1 convs are pure HBM bandwidth: size blocks in bytes (input block plus
    # the two branch output blocks) -> MB-scale tiles, not 4K-element tiles.
    th = _row_tile(H, W, Cin + 2 * mid, isz, min(4 << 20, vmem // 8))
    kernel = functools.partial(_stem_kernel, T=th * W)
    wspec = lambda shape: pl.BlockSpec(shape, lambda n, t: (0,) * len(shape))
    y1, y2 = pl.pallas_call(
        kernel,
        out_shape=(jax.ShapeDtypeStruct((N, H, W, mid), x.dtype),
                   jax.ShapeDtypeStruct((N, H, W, mid), x.dtype)),
        grid=(N, H // th),
        in_specs=[
            pl.BlockSpec((1, th, W, Cin), lambda n, t: (n, t, 0, 0)),
            wspec((Cin, mid)), wspec((1, mid)), wspec((1, mid)),
            wspec((Cin, mid)), wspec((1, mid)), wspec((1, mid)),
        ],
        out_specs=(pl.BlockSpec((1, th, W, mid), lambda n, t: (n, t, 0, 0)),
                   pl.BlockSpec((1, th, W, mid), lambda n, t: (n, t, 0, 0))),
        compiler_params=pltpu.CompilerParams(
            dimension_semantics=("parallel", "parallel"),
            vmem_limit_bytes=vmem),
    )(x, w1, s1, b1, w2, s2, b2)
    return y1, y2


def residual_unit(y, wa, sa, ba, wb9, sb, bb, add=True, row_tile=None):
    """Fused Residual(ch): 1x1 Conv+BN+SiLU -> 3x3 Conv+BN+SiLU (+y if add).

    Row-tiled over H; the 3x3 conv's +-1-row halo is fetched as two extra
    1-row blocks (clamped at the border, masked to zero padding in-kernel).
    """
    N, H, W, C = y.shape
    isz = jnp.dtype(y.dtype).itemsize
    vmem = _vmem_limit_bytes()
    if row_tile is None:
        # Main-block byte budget; the kernel additionally keeps the padded
        # plane, the 3 shifted planes and a f32 accumulator (~6x) in VMEM.
        row_tile = _row_tile(H, W, C, isz, min(1 << 20, vmem // 24))
    th = row_tile
    assert H % th == 0, (H, th)
    kernel = functools.partial(_residual_unit_kernel, TH=th, W=W, add=add)
    wspec = lambda shape: pl.BlockSpec(shape, lambda n, t: (0,) * len(shape))
    return pl.pallas_call(
        kernel,
        out_shape=jax.ShapeDtypeStruct((N, H, W, C), y.dtype),
        grid=(N, H // th),
        in_specs=[
            pl.BlockSpec((1, th, W, C), lambda n, t: (n, t, 0, 0)),
            pl.BlockSpec((1, 1, W, C),
                         lambda n, t: (n, jnp.maximum(t * th - 1, 0), 0, 0)),
            pl.BlockSpec((1, 1, W, C),
                         lambda n, t: (n, jnp.minimum(t * th + th, H - 1), 0, 0)),
            # TODO(synk): pipeline_mode=pl.Buffered(1) on these invariant
            # weight blocks once single-buffering is universally supported.
            wspec((C, C)), wspec((1, C)), wspec((1, C)),
            wspec((9, C, C)), wspec((1, C)), wspec((1, C)),
        ],
        out_specs=pl.BlockSpec((1, th, W, C), lambda n, t: (n, t, 0, 0)),
        scratch_shapes=[pltpu.VMEM((th + 2, W + 16, C), y.dtype),
                        pltpu.VMEM((3, th + 2, W, C), y.dtype)],
        compiler_params=pltpu.CompilerParams(
            dimension_semantics=("parallel", "parallel"),
            vmem_limit_bytes=vmem),
    )(y, y, y, wa, sa, ba, wb9, sb, bb)


def csp_head(y1, y2, w3a, w3b, s3, b3):
    """Concat-free conv3 (1x1). y1, y2: (N,H,W,mid) -> (N,H,W,out_ch)."""
    N, H, W, C = y1.shape
    cout = w3a.shape[-1]
    isz = jnp.dtype(y1.dtype).itemsize
    vmem = _vmem_limit_bytes()
    th = _row_tile(H, W, 2 * C + cout, isz, min(4 << 20, vmem // 8))
    kernel = functools.partial(_head_kernel, T=th * W)
    wspec = lambda shape: pl.BlockSpec(shape, lambda n, t: (0,) * len(shape))
    return pl.pallas_call(
        kernel,
        out_shape=jax.ShapeDtypeStruct((N, H, W, cout), y1.dtype),
        grid=(N, H // th),
        in_specs=[
            pl.BlockSpec((1, th, W, C), lambda n, t: (n, t, 0, 0)),
            pl.BlockSpec((1, th, W, C), lambda n, t: (n, t, 0, 0)),
            wspec((C, cout)), wspec((C, cout)),
            wspec((1, cout)), wspec((1, cout)),
        ],
        out_specs=pl.BlockSpec((1, th, W, cout), lambda n, t: (n, t, 0, 0)),
        compiler_params=pltpu.CompilerParams(
            dimension_semantics=("parallel", "parallel"),
            vmem_limit_bytes=vmem),
    )(y1, y2, w3a, w3b, s3, b3)


# ----------------------------------------------------------------------------
# Parameter init (deterministic, synthetic). BatchNorm (eval-mode) is folded:
#   scale = gamma / sqrt(running_var + eps),  bias = beta - running_mean*scale
# ----------------------------------------------------------------------------
_BN_EPS = 1e-3  # BatchNorm2d(out_ch, 0.001, 0.03) -> eps = 0.001


def make_conv_params(key, cin, cout, k):
    kw, kg, kb, km, kv = jax.random.split(key, 5)
    w = 0.1 * jax.random.normal(kw, (k, k, cin, cout), jnp.float32)
    gamma = 1.0 + 0.1 * jax.random.normal(kg, (cout,), jnp.float32)
    beta = 0.1 * jax.random.normal(kb, (cout,), jnp.float32)
    running_mean = 0.1 * jax.random.normal(km, (cout,), jnp.float32)
    running_var = 1.0 + 0.1 * jax.random.uniform(kv, (cout,), jnp.float32)
    scale = gamma / jnp.sqrt(running_var + _BN_EPS)
    bias = beta - running_mean * scale
    return w, scale.reshape(1, cout), bias.reshape(1, cout)


def init_csp_params(key, in_ch, out_ch, n):
    mid = out_ch // 2
    keys = jax.random.split(key, 3 + 2 * n)
    params = {
        "conv1": make_conv_params(keys[0], in_ch, mid, 1),
        "conv2": make_conv_params(keys[1], in_ch, mid, 1),
        "conv3": make_conv_params(keys[2], out_ch, out_ch, 1),
        "res": [],
    }
    for i in range(n):
        r1 = make_conv_params(keys[3 + 2 * i], mid, mid, 1)   # Conv(ch, ch, 1)
        r2 = make_conv_params(keys[4 + 2 * i], mid, mid, 3)   # Conv(ch, ch, 3)
        params["res"].append((r1, r2))
    return params


# ----------------------------------------------------------------------------
# CSP forward (matches torch CSP.forward semantics; NCHW in, NCHW out)
# ----------------------------------------------------------------------------
def csp_forward(x_nchw, params, add=True):
    x = jnp.transpose(x_nchw, (0, 2, 3, 1))            # NCHW -> NHWC
    w1, s1, b1 = params["conv1"]
    w2, s2, b2 = params["conv2"]
    mid = w1.shape[-1]

    y1, y2 = csp_stem(x, w1[0, 0], s1, b1, w2[0, 0], s2, b2)

    for (r1, r2) in params["res"]:
        (wa, sa, ba), (wb, sb, bb) = r1, r2
        y1 = residual_unit(y1, wa[0, 0], sa, ba,
                           wb.reshape(9, mid, mid), sb, bb, add=add)

    w3, s3, b3 = params["conv3"]
    w3f = w3[0, 0]                                      # (out_ch, out_ch)
    out = csp_head(y1, y2, w3f[:mid], w3f[mid:], s3, b3)
    return jnp.transpose(out, (0, 3, 1, 2))             # NHWC -> NCHW


# ----------------------------------------------------------------------------
# Pure-JAX reference (for correctness sanity check)
# ----------------------------------------------------------------------------
def _ref_conv(x, w, scale, bias):
    y = jax.lax.conv_general_dilated(
        x, w, window_strides=(1, 1), padding="SAME",
        dimension_numbers=("NHWC", "HWIO", "NHWC"))
    y = y * scale.reshape(1, 1, 1, -1) + bias.reshape(1, 1, 1, -1)
    return y * jax.nn.sigmoid(y)


def csp_reference(x_nchw, params, add=True):
    x = jnp.transpose(x_nchw, (0, 2, 3, 1))
    w1, s1, b1 = params["conv1"]
    y1 = _ref_conv(x, w1, s1, b1)
    for (r1, r2) in params["res"]:
        wa, sa, ba = r1
        wb, sb, bb = r2
        r = _ref_conv(_ref_conv(y1, wa, sa, ba), wb, sb, bb)
        y1 = r + y1 if add else r
    w2, s2, b2 = params["conv2"]
    y2 = _ref_conv(x, w2, s2, b2)
    cat = jnp.concatenate([y1, y2], axis=-1)
    w3, s3, b3 = params["conv3"]
    out = _ref_conv(cat, w3, s3, b3)
    return jnp.transpose(out, (0, 3, 1, 2))


if __name__ == "__main__":
    key = jax.random.PRNGKey(0)
    kx, kp, ky = jax.random.split(key, 3)

    N, in_ch, out_ch, H, W, n_res = 2, 4, 8, 16, 16, 1
    x = jax.random.normal(kx, (N, in_ch, H, W), jnp.float32)
    params = init_csp_params(kp, in_ch, out_ch, n_res)

    out = csp_forward(x, params, add=True)
    out = jax.block_until_ready(out)
    assert out.shape == (N, out_ch, H, W), out.shape

    ref = csp_reference(x, params, add=True)
    if not jnp.allclose(out, ref, atol=2e-3, rtol=2e-3):
        raise AssertionError("Pallas CSP output mismatch vs JAX reference")

    # Extra check of the row-tiled halo path: force 4-row tiles so the 3x3
    # conv crosses tile boundaries through the halo-row fetch + edge masking.
    mid = out_ch // 2
    yt = jax.random.normal(ky, (N, H, W, mid), jnp.float32)
    (wa, sa, ba), (wb, sb, bb) = params["res"][0]
    tiled = residual_unit(yt, wa[0, 0], sa, ba, wb.reshape(9, mid, mid),
                          sb, bb, add=True, row_tile=4)
    tiled = jax.block_until_ready(tiled)
    tiled_ref = _ref_conv(_ref_conv(yt, wa, sa, ba), wb, sb, bb) + yt
    if not jnp.allclose(tiled, tiled_ref, atol=2e-3, rtol=2e-3):
        raise AssertionError("row-tiled residual unit mismatch vs reference")

    print("KERNEL_OK")
</pallas_src>

<mosaic_0001>
module attributes {stable_mosaic.version = 11 : i64} {
  func.func @_stem_kernel(%arg0: i32, %arg1: i32, %arg2: memref<1x16x16x4xf32, #tpu.memory_space<vmem>>, %arg3: memref<4x4xf32, #tpu.memory_space<vmem>>, %arg4: memref<1x4xf32, #tpu.memory_space<vmem>>, %arg5: memref<1x4xf32, #tpu.memory_space<vmem>>, %arg6: memref<4x4xf32, #tpu.memory_space<vmem>>, %arg7: memref<1x4xf32, #tpu.memory_space<vmem>>, %arg8: memref<1x4xf32, #tpu.memory_space<vmem>>, %arg9: memref<1x16x16x4xf32, #tpu.memory_space<vmem>>, %arg10: memref<1x16x16x4xf32, #tpu.memory_space<vmem>>) attributes {dimension_semantics = [#tpu.dimension_semantics<parallel>, #tpu.dimension_semantics<parallel>], iteration_bounds = array<i64: 2, 1>, scalar_prefetch = 0 : i64, scratch_operands = 0 : i64, tpu.core_type = #tpu.core_type<tc>, window_params = [{transform_indices = @transform_0, window_bounds = array<i64: 1, 16, 16, 4>}, {pipeline_mode = #tpu.pipeline_mode<synchronous>, transform_indices = @transform_1, window_bounds = array<i64: 4, 4>}, {pipeline_mode = #tpu.pipeline_mode<synchronous>, transform_indices = @transform_2, window_bounds = array<i64: 1, 4>}, {pipeline_mode = #tpu.pipeline_mode<synchronous>, transform_indices = @transform_3, window_bounds = array<i64: 1, 4>}, {pipeline_mode = #tpu.pipeline_mode<synchronous>, transform_indices = @transform_4, window_bounds = array<i64: 4, 4>}, {pipeline_mode = #tpu.pipeline_mode<synchronous>, transform_indices = @transform_5, window_bounds = array<i64: 1, 4>}, {pipeline_mode = #tpu.pipeline_mode<synchronous>, transform_indices = @transform_6, window_bounds = array<i64: 1, 4>}, {transform_indices = @transform_7, window_bounds = array<i64: 1, 16, 16, 4>}, {transform_indices = @transform_8, window_bounds = array<i64: 1, 16, 16, 4>}]} {
    %c0 = arith.constant 0 : index
    %c0_0 = arith.constant 0 : index
    %c0_1 = arith.constant 0 : index
    %c0_2 = arith.constant 0 : index
    %0 = vector.load %arg2[%c0, %c0_0, %c0_1, %c0_2] : memref<1x16x16x4xf32, #tpu.memory_space<vmem>>, vector<1x16x16x4xf32>
    %1 = vector.shape_cast %0 : vector<1x16x16x4xf32> to vector<16x16x4xf32>
    %2 = vector.shape_cast %1 : vector<16x16x4xf32> to vector<256x4xf32>
    %c0_3 = arith.constant 0 : index
    %c0_4 = arith.constant 0 : index
    %3 = vector.load %arg3[%c0_3, %c0_4] : memref<4x4xf32, #tpu.memory_space<vmem>>, vector<4x4xf32>
    %cst = arith.constant dense<0.000000e+00> : vector<256x4xf32>
    %4 = tpu.matmul %2, %3, %cst {dimension_numbers = #tpu.dot_dimension_numbers<[1], [0], [0], [1], [0, 0, 1, 1], [], []>} : vector<256x4xf32>, vector<4x4xf32>, vector<256x4xf32> -> vector<256x4xf32>
    %c0_5 = arith.constant 0 : index
    %c0_6 = arith.constant 0 : index
    %5 = vector.load %arg4[%c0_5, %c0_6] : memref<1x4xf32, #tpu.memory_space<vmem>>, vector<1x4xf32>
    %6 = vector.broadcast %5 : vector<1x4xf32> to vector<256x4xf32>
    %7 = arith.mulf %4, %6 : vector<256x4xf32>
    %c0_7 = arith.constant 0 : index
    %c0_8 = arith.constant 0 : index
    %8 = vector.load %arg5[%c0_7, %c0_8] : memref<1x4xf32, #tpu.memory_space<vmem>>, vector<1x4xf32>
    %9 = vector.broadcast %8 : vector<1x4xf32> to vector<256x4xf32>
    %10 = arith.addf %7, %9 : vector<256x4xf32>
    %cst_9 = arith.constant 0.000000e+00 : f32
    %11 = vector.broadcast %cst_9 : f32 to vector<256x4xf32>
    %12 = arith.subf %11, %10 : vector<256x4xf32>
    %13 = math.exp %12 : vector<256x4xf32>
    %cst_10 = arith.constant 1.000000e+00 : f32
    %14 = vector.broadcast %cst_10 : f32 to vector<256x4xf32>
    %15 = arith.addf %14, %13 : vector<256x4xf32>
    %16 = tpu.reciprocal %15 : vector<256x4xf32> -> vector<256x4xf32>
    %17 = arith.mulf %10, %16 : vector<256x4xf32>
    %18 = vector.shape_cast %17 : vector<256x4xf32> to vector<16x16x4xf32>
    %c0_11 = arith.constant 0 : index
    %c0_12 = arith.constant 0 : index
    %c0_13 = arith.constant 0 : index
    %c0_14 = arith.constant 0 : index
    %19 = vector.load %arg9[%c0_11, %c0_12, %c0_13, %c0_14] : memref<1x16x16x4xf32, #tpu.memory_space<vmem>>, vector<1x16x16x4xf32>
    %20 = vector.shape_cast %19 : vector<1x16x16x4xf32> to vector<16x16x4xf32>
    %21 = vector.shape_cast %18 : vector<16x16x4xf32> to vector<1x16x16x4xf32>
    tpu.vector_store %arg9[%c0_11, %c0_12, %c0_13, %c0_14], %21 {strides = array<i32>} : memref<1x16x16x4xf32, #tpu.memory_space<vmem>>, vector<1x16x16x4xf32>,
    %c0_15 = arith.constant 0 : index
    %c0_16 = arith.constant 0 : index
    %22 = vector.load %arg6[%c0_15, %c0_16] : memref<4x4xf32, #tpu.memory_space<vmem>>, vector<4x4xf32>
    %cst_17 = arith.constant dense<0.000000e+00> : vector<256x4xf32>
    %23 = tpu.matmul %2, %22, %cst_17 {dimension_numbers = #tpu.dot_dimension_numbers<[1], [0], [0], [1], [0, 0, 1, 1], [], []>} : vector<256x4xf32>, vector<4x4xf32>, vector<256x4xf32> -> vector<256x4xf32>
    %c0_18 = arith.constant 0 : index
    %c0_19 = arith.constant 0 : index
    %24 = vector.load %arg7[%c0_18, %c0_19] : memref<1x4xf32, #tpu.memory_space<vmem>>, vector<1x4xf32>
    %25 = vector.broadcast %24 : vector<1x4xf32> to vector<256x4xf32>
    %26 = arith.mulf %23, %25 : vector<256x4xf32>
    %c0_20 = arith.constant 0 : index
    %c0_21 = arith.constant 0 : index
    %27 = vector.load %arg8[%c0_20, %c0_21] : memref<1x4xf32, #tpu.memory_space<vmem>>, vector<1x4xf32>
    %28 = vector.broadcast %27 : vector<1x4xf32> to vector<256x4xf32>
    %29 = arith.addf %26, %28 : vector<256x4xf32>
    %cst_22 = arith.constant 0.000000e+00 : f32
    %30 = vector.broadcast %cst_22 : f32 to vector<256x4xf32>
    %31 = arith.subf %30, %29 : vector<256x4xf32>
    %32 = math.exp %31 : vector<256x4xf32>
    %cst_23 = arith.constant 1.000000e+00 : f32
    %33 = vector.broadcast %cst_23 : f32 to vector<256x4xf32>
    %34 = arith.addf %33, %32 : vector<256x4xf32>
    %35 = tpu.reciprocal %34 : vector<256x4xf32> -> vector<256x4xf32>
    %36 = arith.mulf %29, %35 : vector<256x4xf32>
    %37 = vector.shape_cast %36 : vector<256x4xf32> to vector<16x16x4xf32>
    %c0_24 = arith.constant 0 : index
    %c0_25 = arith.constant 0 : index
    %c0_26 = arith.constant 0 : index
    %c0_27 = arith.constant 0 : index
    %38 = vector.load %arg10[%c0_24, %c0_25, %c0_26, %c0_27] : memref<1x16x16x4xf32, #tpu.memory_space<vmem>>, vector<1x16x16x4xf32>
    %39 = vector.shape_cast %38 : vector<1x16x16x4xf32> to vector<16x16x4xf32>
    %40 = vector.shape_cast %37 : vector<16x16x4xf32> to vector<1x16x16x4xf32>
    tpu.vector_store %arg10[%c0_24, %c0_25, %c0_26, %c0_27], %40 {strides = array<i32>} : memref<1x16x16x4xf32, #tpu.memory_space<vmem>>, vector<1x16x16x4xf32>,
    return
  }
  func.func @transform_0(%arg0: i32, %arg1: i32) -> (i32, i32, i32, i32) {
    %c0_i32 = arith.constant 0 : i32
    %c0_i32_0 = arith.constant 0 : i32
    %c0_i32_1 = arith.constant 0 : i32
    return %arg0, %arg1, %c0_i32, %c0_i32_0 : i32, i32, i32, i32
  }
  func.func @transform_1(%arg0: i32, %arg1: i32) -> (i32, i32) {
    %c0_i32 = arith.constant 0 : i32
    %c0_i32_0 = arith.constant 0 : i32
    %c0_i32_1 = arith.constant 0 : i32
    return %c0_i32, %c0_i32_0 : i32, i32
  }
  func.func @transform_2(%arg0: i32, %arg1: i32) -> (i32, i32) {
    %c0_i32 = arith.constant 0 : i32
    %c0_i32_0 = arith.constant 0 : i32
    %c0_i32_1 = arith.constant 0 : i32
    return %c0_i32, %c0_i32_0 : i32, i32
  }
  func.func @transform_3(%arg0: i32, %arg1: i32) -> (i32, i32) {
    %c0_i32 = arith.constant 0 : i32
    %c0_i32_0 = arith.constant 0 : i32
    %c0_i32_1 = arith.constant 0 : i32
    return %c0_i32, %c0_i32_0 : i32, i32
  }
  func.func @transform_4(%arg0: i32, %arg1: i32) -> (i32, i32) {
    %c0_i32 = arith.constant 0 : i32
    %c0_i32_0 = arith.constant 0 : i32
    %c0_i32_1 = arith.constant 0 : i32
    return %c0_i32, %c0_i32_0 : i32, i32
  }
  func.func @transform_5(%arg0: i32, %arg1: i32) -> (i32, i32) {
    %c0_i32 = arith.constant 0 : i32
    %c0_i32_0 = arith.constant 0 : i32
    %c0_i32_1 = arith.constant 0 : i32
    return %c0_i32, %c0_i32_0 : i32, i32
  }
  func.func @transform_6(%arg0: i32, %arg1: i32) -> (i32, i32) {
    %c0_i32 = arith.constant 0 : i32
    %c0_i32_0 = arith.constant 0 : i32
    %c0_i32_1 = arith.constant 0 : i32
    return %c0_i32, %c0_i32_0 : i32, i32
  }
  func.func @transform_7(%arg0: i32, %arg1: i32) -> (i32, i32, i32, i32) {
    %c0_i32 = arith.constant 0 : i32
    %c0_i32_0 = arith.constant 0 : i32
    %c0_i32_1 = arith.constant 0 : i32
    return %arg0, %arg1, %c0_i32, %c0_i32_0 : i32, i32, i32, i32
  }
  func.func @transform_8(%arg0: i32, %arg1: i32) -> (i32, i32, i32, i32) {
    %c0_i32 = arith.constant 0 : i32
    %c0_i32_0 = arith.constant 0 : i32
    %c0_i32_1 = arith.constant 0 : i32
    return %arg0, %arg1, %c0_i32, %c0_i32_0 : i32, i32, i32, i32
  }
}

</mosaic_0001>

<bundles_post_ra>
// kernel: tpu_custom_call.1
= control target key start
LH: loop header
LB: loop body
LE: loop exit
PB: predicated region body
PF: predicated region fallthrough
CT: control target
= control target key end

     0   :  { %s2761_s27 = smov 0   ;;  %s2763_s28 = smov 0   ;;  %s4419_s0 = inlined_call_operand.vmem [shape: f32[2,16,16,4], index: 0, kind: input, shape index: {}]   ;;  %s4420_s1 = inlined_call_operand.vmem [shape: f32[4,4], index: 1, kind: input, shape index: {}]   ;;  %s4421_s2 = inlined_call_operand.vmem [shape: f32[1,4], index: 2, kind: input, shape index: {}]   ;;  %s4422_s3 = inlined_call_operand.vmem [shape: f32[1,4], index: 3, kind: input, shape index: {}]   ;;  %s4423_s4 = inlined_call_operand.vmem [shape: f32[4,4], index: 4, kind: input, shape index: {}]   ;;  %s4424_s5 = inlined_call_operand.vmem [shape: f32[1,4], index: 5, kind: input, shape index: {}]   ;;  %s4425_s6 = inlined_call_operand.vmem [shape: f32[1,4], index: 6, kind: input, shape index: {}]   ;;  %s4426_s7 = inlined_call_operand.vmem [shape: f32[2,16,16,4], index: 7, kind: output, shape index: {0}]   ;;  %s4427_s8 = inlined_call_operand.vmem [shape: f32[2,16,16,4], index: 8, kind: output, shape index: {1}]  }
   0x1   :  { %s2765_s29 = smov 0  }
   0x2 LB: > { %s31_s30 = sadd.s32 1, %s2710_s28  ;;  %p2320_p0 = scmp.ge.s32.totalorder %s2714_s29, 1  ;;  %s2714_s29 = sphi %s2765_s29, %s19_s29   ;;  %s2710_s28 = sphi %s2763_s28, %s4535_s28   ;;  %s2706_s27 = sphi %s2761_s27, %s4534_s27  }
   0x3   : > { %p33_p1 = scmp.ge.s32.totalorder %s31_s30, 2  ;;  %p289_p2 = scmp.lt.s32.totalorder %s2714_s29, 3 }
   0x5   : > { %s4537_s30 = smov (%p33_p1, %s31_s30), 0  ;;  %p290_p3 = pnand %p2320_p0, %p289_p2 }
   0x6   : > { %p344_p4 = scmp.lt.s32.totalorder (!%p290_p3), %s2706_s27, 1 }
   0x7   : > { %293 = sbr.rel (%p290_p3) target bundleno = 481 (0x1e1), region = 48 }
   0xc   : > { %v408_v0 = vld [vmem:[%s4420_s1] sm:$0xf]  ;;  %vm506_vm0 = vcmask 1043456   ;;  %s4539_s27 = smov (!%p344_p4, %s2706_s27), 1  ;;  %vm409_vm1 = vcmask 31744  }
   0xd   : > { %v1335_v1 = vld [vmem:[%s4423_s4] sm:$0xf]  ;;  %2327 = vmatpush.msk.msra.mxu0 %vm506_vm0, %v408_v0  ;;  %2398 = vmatpush.msk.msra.mxu2 %vm506_vm0, %v408_v0  ;;  %s2785_s13 = sshll.u32 %s4539_s27, 8 }
   0xe   : > { %2360 = vmatpush.msk.msra.mxu1 %vm506_vm0, %v1335_v1  ;;  %2399 = vmatpush.msk.msra.mxu3 %vm506_vm0, %v1335_v1  ;;  %s2791_s16 = scalar_lea.vmem %s4419_s0, %s2785_s13  ;;  %v2892_v34 = vld [vmem:[%s4421_s2] ss:$0 sm:$0xff]  ;;  %s3025_s27 = scalar_lea.vmem %s4426_s7, %s2785_s13 }
   0xf   : > { %v376_v2 = vld [vmem:[%s2791_s16] sm:$0xff]  ;;  %v377_v4 = vld [vmem:[%s2791_s16 + $0x8] sm:$0xff]  ;;  %v378_v6 = vld [vmem:[%s2791_s16 + $0x10] sm:$0xff]  ;;  %s3035_s11 = scalar_lea.vmem %s4427_s8, %s2785_s13 }
  0x10   : > { %v392_v3 = vld [vmem:[%s2791_s16 + $0x80] sm:$0xff]  ;;  %2328 = vmatmul.msk.f32.vlgmr.msra.gmra.mxu0 %vm409_vm1, %v376_v2  ;;  %2361 = vmatmul.msk.f32.vlgmr.msra.gmra.mxu1 %vm409_vm1, %v376_v2  ;;  %v393_v5 = vld [vmem:[%s2791_s16 + $0x88] sm:$0xff]  ;;  %v394_v7 = vld [vmem:[%s2791_s16 + $0x90] sm:$0xff] }
  0x11   : > { %2344 = vmatmul.msk.f32.vlgmr.msra.gmra.mxu2 %vm409_vm1, %v392_v3  ;;  %2377 = vmatmul.msk.f32.vlgmr.msra.gmra.mxu3 %vm409_vm1, %v392_v3  ;;  %v379_v8 = vld [vmem:[%s2791_s16 + $0x18] sm:$0xff]  ;;  %v380_v10 = vld [vmem:[%s2791_s16 + $0x20] sm:$0xff]  ;;  %v381_v12 = vld [vmem:[%s2791_s16 + $0x28] sm:$0xff] }
  0x12   : > { %v395_v9 = vld [vmem:[%s2791_s16 + $0x98] sm:$0xff]  ;;  %v396_v11 = vld [vmem:[%s2791_s16 + $0xa0] sm:$0xff]  ;;  %v397_v13 = vld [vmem:[%s2791_s16 + $0xa8] sm:$0xff] }
  0x13   : > { %v382_v14 = vld [vmem:[%s2791_s16 + $0x30] sm:$0xff]  ;;  %v383_v16 = vld [vmem:[%s2791_s16 + $0x38] sm:$0xff]  ;;  %v384_v18 = vld [vmem:[%s2791_s16 + $0x40] sm:$0xff] }
  0x14   : > { %v398_v15 = vld [vmem:[%s2791_s16 + $0xb0] sm:$0xff]  ;;  %v399_v17 = vld [vmem:[%s2791_s16 + $0xb8] sm:$0xff]  ;;  %v400_v19 = vld [vmem:[%s2791_s16 + $0xc0] sm:$0xff] }
  0x15   : > { %v385_v20 = vld [vmem:[%s2791_s16 + $0x48] sm:$0xff]  ;;  %v386_v22 = vld [vmem:[%s2791_s16 + $0x50] sm:$0xff]  ;;  %v387_v24 = vld [vmem:[%s2791_s16 + $0x58] sm:$0xff] }
  0x16   : > { %v401_v21 = vld [vmem:[%s2791_s16 + $0xc8] sm:$0xff]  ;;  %v402_v23 = vld [vmem:[%s2791_s16 + $0xd0] sm:$0xff]  ;;  %v403_v25 = vld [vmem:[%s2791_s16 + $0xd8] sm:$0xff] }
  0x17   : > { %v388_v26 = vld [vmem:[%s2791_s16 + $0x60] sm:$0xff]  ;;  %v389_v28 = vld [vmem:[%s2791_s16 + $0x68] sm:$0xff]  ;;  %v390_v30 = vld [vmem:[%s2791_s16 + $0x70] sm:$0xff] }
  0x18   : > { %2329 = vmatmul.msk.f32.gmra.mxu0 %vm409_vm1, %v377_v4  ;;  %2362 = vmatmul.msk.f32.gmra.mxu1 %vm409_vm1, %v377_v4  ;;  %v404_v27 = vld [vmem:[%s2791_s16 + $0xe0] sm:$0xff]  ;;  %v405_v29 = vld [vmem:[%s2791_s16 + $0xe8] sm:$0xff]  ;;  %v406_v31 = vld [vmem:[%s2791_s16 + $0xf0] sm:$0xff] }
  0x19   : > { %2345 = vmatmul.msk.f32.gmra.mxu2 %vm409_vm1, %v393_v5  ;;  %2378 = vmatmul.msk.f32.gmra.mxu3 %vm409_vm1, %v393_v5  ;;  %v391_v32 = vld [vmem:[%s2791_s16 + $0x78] sm:$0xff]  ;;  %v2897_v35 = vld [vmem:[%s4424_s5] ss:$0 sm:$0xff] }
  0x1a   : > { %v407_v33 = vld [vmem:[%s2791_s16 + $0xf8] sm:$0xff]  ;;  %v2902_v36 = vld [vmem:[%s4422_s3] ss:$0 sm:$0xff] }
  0x1b   : > { %v2907_v38 = vld [vmem:[%s4425_s6] ss:$0 sm:$0xff] }
  0x20   : > { %2330 = vmatmul.msk.f32.gmra.mxu0 %vm409_vm1, %v378_v6  ;;  %2363 = vmatmul.msk.f32.gmra.mxu1 %vm409_vm1, %v378_v6 }
  0x21   : > { %2346 = vmatmul.msk.f32.gmra.mxu2 %vm409_vm1, %v394_v7  ;;  %2379 = vmatmul.msk.f32.gmra.mxu3 %vm409_vm1, %v394_v7 }
  0x28   : > { %2331 = vmatmul.msk.f32.gmra.mxu0 %vm409_vm1, %v379_v8  ;;  %2364 = vmatmul.msk.f32.gmra.mxu1 %vm409_vm1, %v379_v8 }
  0x29   : > { %2347 = vmatmul.msk.f32.gmra.mxu2 %vm409_vm1, %v395_v9  ;;  %2380 = vmatmul.msk.f32.gmra.mxu3 %vm409_vm1, %v395_v9 }
  0x30   : > { %2332 = vmatmul.msk.f32.gmra.mxu0 %vm409_vm1, %v380_v10  ;;  %2365 = vmatmul.msk.f32.gmra.mxu1 %vm409_vm1, %v380_v10 }
  0x31   : > { %2348 = vmatmul.msk.f32.gmra.mxu2 %vm409_vm1, %v396_v11  ;;  %2381 = vmatmul.msk.f32.gmra.mxu3 %vm409_vm1, %v396_v11 }
  0x38   : > { %2333 = vmatmul.msk.f32.gmra.mxu0 %vm409_vm1, %v381_v12  ;;  %2366 = vmatmul.msk.f32.gmra.mxu1 %vm409_vm1, %v381_v12 }
  0x39   : > { %2349 = vmatmul.msk.f32.gmra.mxu2 %vm409_vm1, %v397_v13  ;;  %2382 = vmatmul.msk.f32.gmra.mxu3 %vm409_vm1, %v397_v13 }
  0x40   : > { %2334 = vmatmul.msk.f32.gmra.mxu0 %vm409_vm1, %v382_v14  ;;  %2367 = vmatmul.msk.f32.gmra.mxu1 %vm409_vm1, %v382_v14 }
  0x41   : > { %2350 = vmatmul.msk.f32.gmra.mxu2 %vm409_vm1, %v398_v15  ;;  %2383 = vmatmul.msk.f32.gmra.mxu3 %vm409_vm1, %v398_v15 }
  0x48   : > { %2335 = vmatmul.msk.f32.gmra.mxu0 %vm409_vm1, %v383_v16  ;;  %2368 = vmatmul.msk.f32.gmra.mxu1 %vm409_vm1, %v383_v16 }
  0x49   : > { %2351 = vmatmul.msk.f32.gmra.mxu2 %vm409_vm1, %v399_v17  ;;  %2384 = vmatmul.msk.f32.gmra.mxu3 %vm409_vm1, %v399_v17 }
  0x50   : > { %2336 = vmatmul.msk.f32.gmra.mxu0 %vm409_vm1, %v384_v18  ;;  %2369 = vmatmul.msk.f32.gmra.mxu1 %vm409_vm1, %v384_v18 }
  0x51   : > { %2352 = vmatmul.msk.f32.gmra.mxu2 %vm409_vm1, %v400_v19  ;;  %2385 = vmatmul.msk.f32.gmra.mxu3 %vm409_vm1, %v400_v19 }
  0x58   : > { %2337 = vmatmul.msk.f32.gmra.mxu0 %vm409_vm1, %v385_v20  ;;  %2370 = vmatmul.msk.f32.gmra.mxu1 %vm409_vm1, %v385_v20 }
  0x59   : > { %2353 = vmatmul.msk.f32.gmra.mxu2 %vm409_vm1, %v401_v21  ;;  %2386 = vmatmul.msk.f32.gmra.mxu3 %vm409_vm1, %v401_v21 }
  0x60   : > { %2338 = vmatmul.msk.f32.gmra.mxu0 %vm409_vm1, %v386_v22  ;;  %2371 = vmatmul.msk.f32.gmra.mxu1 %vm409_vm1, %v386_v22 }
  0x61   : > { %2354 = vmatmul.msk.f32.gmra.mxu2 %vm409_vm1, %v402_v23  ;;  %2387 = vmatmul.msk.f32.gmra.mxu3 %vm409_vm1, %v402_v23 }
  0x68   : > { %2339 = vmatmul.msk.f32.gmra.mxu0 %vm409_vm1, %v387_v24  ;;  %2372 = vmatmul.msk.f32.gmra.mxu1 %vm409_vm1, %v387_v24 }
  0x69   : > { %2355 = vmatmul.msk.f32.gmra.mxu2 %vm409_vm1, %v403_v25  ;;  %2388 = vmatmul.msk.f32.gmra.mxu3 %vm409_vm1, %v403_v25 }
  0x70   : > { %2340 = vmatmul.msk.f32.gmra.mxu0 %vm409_vm1, %v388_v26  ;;  %2373 = vmatmul.msk.f32.gmra.mxu1 %vm409_vm1, %v388_v26 }
  0x71   : > { %2356 = vmatmul.msk.f32.gmra.mxu2 %vm409_vm1, %v404_v27  ;;  %2389 = vmatmul.msk.f32.gmra.mxu3 %vm409_vm1, %v404_v27 }
  0x78   : > { %2341 = vmatmul.msk.f32.gmra.mxu0 %vm409_vm1, %v389_v28  ;;  %2374 = vmatmul.msk.f32.gmra.mxu1 %vm409_vm1, %v389_v28 }
  0x79   : > { %2357 = vmatmul.msk.f32.gmra.mxu2 %vm409_vm1, %v405_v29  ;;  %2390 = vmatmul.msk.f32.gmra.mxu3 %vm409_vm1, %v405_v29 }
  0x80   : > { %2342 = vmatmul.msk.f32.gmra.mxu0 %vm409_vm1, %v390_v30  ;;  %2375 = vmatmul.msk.f32.gmra.mxu1 %vm409_vm1, %v390_v30 }
  0x81   : > { %2358 = vmatmul.msk.f32.gmra.mxu2 %vm409_vm1, %v406_v31  ;;  %2391 = vmatmul.msk.f32.gmra.mxu3 %vm409_vm1, %v406_v31 }
  0x88   : > { %2343 = vmatmul.msk.f32.gmra.mxu0 %vm409_vm1, %v391_v32  ;;  %2376 = vmatmul.msk.f32.gmra.mxu1 %vm409_vm1, %v391_v32 }
  0x89   : > { %2359 = vmatmul.msk.f32.gmra.mxu2 %vm409_vm1, %v407_v33  ;;  %2392 = vmatmul.msk.f32.gmra.mxu3 %vm409_vm1, %v407_v33 }
  0x8d   : > { %v527_v37 = vpop.f32.mrf.mxu0  ;;  %v1356_v40 = vpop.f32.mrf.mxu1 }
  0x8e   : > { %v627_v39 = vmul.f32 %v2892_v34, %v527_v37  ;;  %v1456_v41 = vmul.f32 %v2897_v35, %v1356_v40 }
  0x90   : > { %v2912_v42 = vadd.f32 %v2902_v36, %v627_v39  ;;  %v2915_v43 = vadd.f32 %v2907_v38, %v1456_v41 }
  0x92   : > { %v695_v44 = vsub.f32 0.0, %v2912_v42  ;;  %v1524_v45 = vsub.f32 0.0, %v2915_v43 }
  0x94   : > { %v575_v46 = vpop.f32.mrf.mxu2  ;;  %v727_v47 = vmul.f32 1.442695, %v695_v44  ;;  %v1404_v49 = vpop.f32.mrf.mxu3  ;;  %v1556_v50 = vmul.f32 1.442695, %v1524_v45 }
  0x95   : > { %v643_v48 = vmul.f32 %v2892_v34, %v575_v46  ;;  %v1472_v51 = vmul.f32 %v2897_v35, %v1404_v49  ;;  %v530_v52 = vpop.f32.mrf.mxu0  ;;  %v1359_v55 = vpop.f32.mrf.mxu1 }
  0x96   : > { %2428 = vpow2.f32 %v727_v47  ;;  %v628_v54 = vmul.f32 %v2892_v34, %v530_v52  ;;  %v1457_v57 = vmul.f32 %v2897_v35, %v1359_v55 }
  0x97   : > { %v2922_v53 = vadd.f32 %v2902_v36, %v643_v48  ;;  %2430 = vpow2.f32 %v1556_v50  ;;  %v2926_v56 = vadd.f32 %v2907_v38, %v1472_v51 }
  0x98   : > { %v2931_v59 = vadd.f32 %v2902_v36, %v628_v54  ;;  %v2935_v61 = vadd.f32 %v2907_v38, %v1457_v57 }
  0x99   : > { %v711_v58 = vsub.f32 0.0, %v2922_v53  ;;  %v1540_v60 = vsub.f32 0.0, %v2926_v56 }
  0x9a   : > { %v696_v63 = vsub.f32 0.0, %v2931_v59  ;;  %v1525_v1 = vsub.f32 0.0, %v2935_v61 }
  0x9b   : > { %v759_v62 = vmul.f32 1.442695, %v711_v58  ;;  %v1588_v0 = vmul.f32 1.442695, %v1540_v60 }
  0x9c   : > { %v578_v2 = vpop.f32.mrf.mxu2  ;;  %v2429_v3 = vpop.eup %2428  ;;  %v729_v4 = vmul.f32 1.442695, %v696_v63  ;;  %v1558_v9 = vmul.f32 1.442695, %v1525_v1 }
  0x9d   : > { %2432 = vpow2.f32 %v759_v62  ;;  %v644_v5 = vmul.f32 %v2892_v34, %v578_v2  ;;  %v1407_v6 = vpop.f32.mrf.mxu3  ;;  %v2431_v7 = vpop.eup %2430  ;;  %v2940_v8 = vadd.f32 1.0, %v2429_v3 }
  0x9e   : > { %2434 = vpow2.f32 %v1588_v0  ;;  %v533_v10 = vpop.f32.mrf.mxu0  ;;  %v2942_v11 = vadd.f32 1.0, %v2431_v7  ;;  %v1473_v13 = vmul.f32 %v2897_v35, %v1407_v6  ;;  %v1362_v25 = vpop.f32.mrf.mxu1 }
  0x9f   : > { %2436 = vpow2.f32 %v729_v4  ;;  %v2945_v12 = vadd.f32 %v2902_v36, %v644_v5  ;;  %v629_v14 = vmul.f32 %v2892_v34, %v533_v10  ;;  %v834_v15 = vand.u32 2147483648, %v2940_v8 }
  0xa0   : > { %2438 = vrcp.f32 %v2940_v8  ;;  %v1663_v16 = vand.u32 2147483648, %v2942_v11  ;;  %v832_v19 = vand.u32 2147483647, %v2940_v8  ;;  %v2956_v20 = vadd.f32 %v2907_v38, %v1473_v13 }
  0xa1   : > { %2440 = vrcp.f32 %v2942_v11  ;;  %v712_v17 = vsub.f32 0.0, %v2945_v12  ;;  %v1661_v22 = vand.u32 2147483647, %v2942_v11  ;;  %v2962_v24 = vadd.f32 %v2902_v36, %v629_v14 }
  0xa2   : > { %2442 = vpow2.f32 %v1558_v9  ;;  %vm828_vm2 = vweird.f32 %v2940_v8  ;;  %vm1657_vm3 = vweird.f32 %v2942_v11  ;;  %v835_v30 = vor.u32 1.1754944e-38, %v834_v15 }
  0xa3   : > { %v2433_v18 = vpop.eup %2432  ;;  %v1664_v31 = vor.u32 1.1754944e-38, %v1663_v16  ;;  %v761_v32 = vmul.f32 1.442695, %v712_v17  ;;  %vm2970_vm4 = vcmp.eq.f32.partialorder %v832_v19, 8.507059e+37  ;;  %v1541_v40 = vsub.f32 0.0, %v2956_v20 }
  0xa4   : > { %v2435_v21 = vpop.eup %2434  ;;  %v2959_v23 = vadd.f32 1.0, %v2433_v18  ;;  %v581_v28 = vpop.f32.mrf.mxu2  ;;  %v2977_v41 = vmul.f32 %v2897_v35, %v1362_v25  ;;  %vm2980_vm5 = vcmp.eq.f32.partialorder %v1661_v22, 8.507059e+37  ;;  %v697_v48 = vsub.f32 0.0, %v2962_v24 }
  0xa5   : > { %v2437_v26 = vpop.eup %2436  ;;  %v2966_v27 = vadd.f32 1.0, %v2435_v21  ;;  %v2987_v49 = vmul.f32 %v2892_v34, %v581_v28  ;;  %v2999_v1 = vmul.f32 1.442695, %v1541_v40 }
  0xa6   : > { %v2439_v29 = vpop.eup %2438  ;;  %2444 = vrcp.f32 %v2959_v23  ;;  %v1058_v47 = vand.u32 2147483648, %v2959_v23  ;;  %v1056_v51 = vand.u32 2147483647, %v2959_v23  ;;  %v2991_v54 = vadd.f32 1.0, %v2437_v26 }
  0xa7   : > { %v2441_v33 = vpop.eup %2440  ;;  %v824_v37 = vmul.f32 %v2439_v29, %v2940_v8  ;;  %2446 = vrcp.f32 %v2966_v27  ;;  %v1887_v52 = vand.u32 2147483648, %v2966_v27  ;;  %v1885_v57 = vand.u32 2147483647, %v2966_v27 }
  0xa8   : > { %v2443_v44 = vpop.eup %2442  ;;  %v1653_v45 = vmul.f32 %v2441_v33, %v2942_v11  ;;  %2448 = vpow2.f32 %v761_v32  ;;  %vm829_vm6 = vweird.f32 %v2439_v29  ;;  %vm1052_vm7 = vweird.f32 %v2959_v23 }
  0xa9   : > { %v825_v50 = vsub.f32 1.0, %v824_v37  ;;  %v2994_v58 = vadd.f32 1.0, %v2443_v44  ;;  %2450 = vrcp.f32 %v2991_v54  ;;  %vm1658_vm8 = vweird.f32 %v2441_v33  ;;  %vm830_vm11 = vmor %vm828_vm2, %vm829_vm6 }
  0xaa   : > { %v1654_v55 = vsub.f32 1.0, %v1653_v45  ;;  %v1059_v0 = vor.u32 1.1754944e-38, %v1058_v47  ;;  %vm1881_vm9 = vweird.f32 %v2966_v27  ;;  %vm3002_vm10 = vcmp.eq.f32.partialorder %v1056_v51, 8.507059e+37  ;;  %vm1659_vm14 = vmor %vm1657_vm3, %vm1658_vm8 }
  0xab   : > { %v826_v60 = vmul.f32 %v2439_v29, %v825_v50  ;;  %v1888_v6 = vor.u32 1.1754944e-38, %v1887_v52  ;;  %2452 = vrcp.f32 %v2994_v58  ;;  %vm3011_vm12 = vcmp.eq.f32.partialorder %v1885_v57, 8.507059e+37 }
  0xac   : > { %v2445_v62 = vpop.eup %2444  ;;  %v1655_v63 = vmul.f32 %v2441_v33, %v1654_v55  ;;  %vm842_vm13 = vweird.f32 %v2991_v54  ;;  %v846_v13 = vand.u32 2147483647, %v2991_v54  ;;  %v848_v14 = vand.u32 2147483648, %v2991_v54 }
  0xad   : > { %v2447_v2 = vpop.eup %2446  ;;  %v827_v3 = vadd.f32 %v2439_v29, %v826_v60  ;;  %v1048_v4 = vmul.f32 %v2445_v62, %v2959_v23  ;;  %vm1053_vm15 = vweird.f32 %v2445_v62  ;;  %v1675_v21 = vand.u32 2147483647, %v2994_v58  ;;  %v1410_v60 = vpop.f32.mrf.mxu3 }
  0xae   : > { %v1656_v7 = vadd.f32 %v2441_v33, %v1655_v63  ;;  %v1877_v9 = vmul.f32 %v2447_v2, %v2966_v27  ;;  %vm1882_vm0 = vweird.f32 %v2447_v2  ;;  %v2449_v16 = vpop.eup %2448  ;;  %v1677_v28 = vand.u32 2147483648, %v2994_v58 }
  0xaf   : > { %v831_v15 = vsel %vm830_vm11, %v2439_v29, %v827_v3  ;;  %v1049_v8 = vsub.f32 1.0, %v1048_v4  ;;  %v2451_v22 = vpop.eup %2450  ;;  %vm3042_vm2 = vcmp.eq.f32.partialorder %v846_v13, 8.507059e+37  ;;  %v849_v39 = vor.u32 1.1754944e-38, %v848_v14  ;;  %vm1883_vm6 = vmor %vm1881_vm9, %vm1882_vm0 }
  0xb0   : > { %v836_v17 = vsel %vm2970_vm4, %v835_v30, %v831_v15  ;;  %v1660_v18 = vsel %vm1659_vm14, %v2441_v33, %v1656_v7  ;;  %v1878_v19 = vsub.f32 1.0, %v1877_v9  ;;  %v838_v32 = vmul.f32 %v2451_v22, %v2991_v54  ;;  %vm1054_vm4 = vmor %vm1052_vm7, %vm1053_vm15  ;;  %v1365_v9 = vpop.f32.mrf.mxu1  ;;  %v584_v15 = vpop.f32.mrf.mxu2 }
  0xb1   : > { %v1271_v11 = vmul.f32 %v836_v17, %v2912_v42  ;;  %v1665_v25 = vsel %vm2980_vm5, %v1664_v31, %v1660_v18  ;;  %v1050_v26 = vmul.f32 %v2445_v62, %v1049_v8  ;;  %v2453_v42 = vpop.eup %2452  ;;  %vm1671_vm3 = vweird.f32 %v2994_v58 }
  0xb2   : > { %v2100_v29 = vmul.f32 %v1665_v25, %v2915_v43  ;;  %v1879_v30 = vmul.f32 %v2447_v2, %v1878_v19  ;;  %v3049_v31 = vadd.f32 1.0, %v2449_v16  ;;  %v839_v40 = vsub.f32 1.0, %v838_v32 }
  0xb3   : > { %1303 = vst.msk [vmem:[%s3025_s27] sm:$0xff] %vm409_vm1, %v1271_v11  ;;  %v1051_v37 = vadd.f32 %v2445_v62, %v1050_v26  ;;  %vm843_vm5 = vweird.f32 %v2451_v22  ;;  %v1667_v44 = vmul.f32 %v2453_v42, %v2994_v58  ;;  %vm3060_vm8 = vcmp.eq.f32.partialorder %v1675_v21, 8.507059e+37 }
  0xb4   : > { %2132 = vst.msk [vmem:[%s3035_s11] sm:$0xff] %vm409_vm1, %v2100_v29  ;;  %v1880_v43 = vadd.f32 %v2447_v2, %v1879_v30  ;;  %v1678_v47 = vor.u32 1.1754944e-38, %v1677_v28  ;;  %2454 = vrcp.f32 %v3049_v31  ;;  %v840_v51 = vmul.f32 %v2451_v22, %v839_v40  ;;  %vm844_vm9 = vmor %vm842_vm13, %vm843_vm5 }
  0xb5   : > { %v1055_v45 = vsel %vm1054_vm4, %v2445_v62, %v1051_v37  ;;  %v1668_v52 = vsub.f32 1.0, %v1667_v44  ;;  %vm1672_vm7 = vweird.f32 %v2453_v42  ;;  %v1070_v57 = vand.u32 2147483647, %v3049_v31  ;;  %v536_v62 = vpop.f32.mrf.mxu0 }
  0xb6   : > { %v1060_v23 = vsel %vm3002_vm10, %v1059_v0, %v1055_v45  ;;  %v1884_v50 = vsel %vm1883_vm6, %v2447_v2, %v1880_v43  ;;  %v841_v3 = vadd.f32 %v2451_v22, %v840_v51  ;;  %2456 = vpow2.f32 %v2999_v1  ;;  %vm1673_vm10 = vmor %vm1671_vm3, %vm1672_vm7 }
  0xb7   : > { %v1287_v55 = vmul.f32 %v1060_v23, %v2922_v53  ;;  %v1889_v27 = vsel %vm3011_vm12, %v1888_v6, %v1884_v50  ;;  %v1669_v4 = vmul.f32 %v2453_v42, %v1668_v52  ;;  %v1072_v53 = vand.u32 2147483648, %v3049_v31 }
  0xb8   : > { %v2116_v63 = vmul.f32 %v1889_v27, %v2926_v56  ;;  %v731_v0 = vmul.f32 1.442695, %v697_v48  ;;  %v3083_v2 = vadd.f32 %v2907_v38, %v2977_v41  ;;  %v3087_v56 = vadd.f32 %v2902_v36, %v2987_v49 }
  0xb9   : > { %1319 = vst.msk [vmem:[%s3025_s27 + $0x80] sm:$0xff] %vm409_vm1, %v1287_v55  ;;  %v845_v1 = vsel %vm844_vm9, %v2451_v22, %v841_v3  ;;  %v1670_v5 = vadd.f32 %v2453_v42, %v1669_v4  ;;  %v1474_v54 = vmul.f32 %v2897_v35, %v1410_v60  ;;  %v630_v6 = vmul.f32 %v2892_v34, %v536_v62 }
  0xba   : > { %2148 = vst.msk [vmem:[%s3035_s11 + $0x80] sm:$0xff] %vm409_vm1, %v2116_v63  ;;  %v2455_v7 = vpop.eup %2454  ;;  %v850_v48 = vsel %vm3042_vm2, %v849_v39, %v845_v1  ;;  %2458 = vpow2.f32 %v731_v0  ;;  %v1526_v41 = vsub.f32 0.0, %v3083_v2  ;;  %v713_v49 = vsub.f32 0.0, %v3087_v56 }
  0xbb   : > { %v1272_v10 = vmul.f32 %v850_v48, %v2931_v59  ;;  %v1674_v13 = vsel %vm1673_vm10, %v2453_v42, %v1670_v5  ;;  %v1062_v14 = vmul.f32 %v2455_v7, %v3049_v31  ;;  %vm1067_vm11 = vweird.f32 %v2455_v7 }
  0xbc   : > { %v1679_v8 = vsel %vm3060_vm8, %v1678_v47, %v1674_v13  ;;  %v1560_v58 = vmul.f32 1.442695, %v1526_v41  ;;  %v763_v16 = vmul.f32 1.442695, %v713_v49  ;;  %v3105_v17 = vadd.f32 %v2907_v38, %v1474_v54  ;;  %v2457_v18 = vpop.eup %2456 }
  0xbd   : > { %1304 = vst.msk [vmem:[%s3025_s27 + $0x8] sm:$0xff] %vm409_vm1, %v1272_v10  ;;  %v2101_v19 = vmul.f32 %v1679_v8, %v2935_v61  ;;  %v1063_v59 = vsub.f32 1.0, %v1062_v14  ;;  %v3111_v21 = vadd.f32 %v2902_v36, %v630_v6  ;;  %v1459_v22 = vmul.f32 %v2897_v35, %v1365_v9 }
  0xbe   : > { %v3114_v11 = vadd.f32 1.0, %v2457_v18  ;;  %2460 = vpow2.f32 %v1560_v58  ;;  %v1542_v25 = vsub.f32 0.0, %v3105_v17  ;;  %v646_v26 = vmul.f32 %v2892_v34, %v584_v15  ;;  %v1413_v15 = vpop.f32.mrf.mxu3 }
  0xbf   : > { %2133 = vst.msk [vmem:[%s3035_s11 + $0x8] sm:$0xff] %vm409_vm1, %v2101_v19  ;;  %v1064_v28 = vmul.f32 %v2455_v7, %v1063_v59  ;;  %2462 = vpow2.f32 %v763_v16  ;;  %v698_v29 = vsub.f32 0.0, %v3111_v21  ;;  %v3122_v61 = vadd.f32 %v2907_v38, %v1459_v22 }
  0xc0   : > { %v2459_v30 = vpop.eup %2458  ;;  %vm1066_vm12 = vweird.f32 %v3049_v31  ;;  %2464 = vrcp.f32 %v3114_v11  ;;  %v1592_v42 = vmul.f32 1.442695, %v1542_v25  ;;  %v1073_v39 = vor.u32 1.1754944e-38, %v1072_v53 }
  0xc1   : > { %v1065_v32 = vadd.f32 %v2455_v7, %v1064_v28  ;;  %v3126_v33 = vadd.f32 1.0, %v2459_v30  ;;  %v733_v37 = vmul.f32 1.442695, %v698_v29  ;;  %vm1068_vm13 = vmor %vm1066_vm12, %vm1067_vm11  ;;  %v1527_v43 = vsub.f32 0.0, %v3122_v61 }
  0xc2   : > { %v3131_v40 = vadd.f32 %v2902_v36, %v646_v26  ;;  %vm1071_vm14 = vcmp.eq.f32.partialorder %v1070_v57, 8.507059e+37  ;;  %v1899_v46 = vand.u32 2147483647, %v3114_v11  ;;  %v1901_v47 = vand.u32 2147483648, %v3114_v11 }
  0xc3   : > { %v1069_v44 = vsel %vm1068_vm13, %v2455_v7, %v1065_v32  ;;  %2466 = vrcp.f32 %v3126_v33  ;;  %v1562_v52 = vmul.f32 1.442695, %v1527_v43  ;;  %v860_v27 = vand.u32 2147483647, %v3126_v33 }
  0xc4   : > { %v2461_v31 = vpop.eup %2460  ;;  %v1074_v45 = vsel %vm1071_vm14, %v1073_v39, %v1069_v44  ;;  %2468 = vpow2.f32 %v1592_v42  ;;  %v714_v60 = vsub.f32 0.0, %v3131_v40  ;;  %vm1895_vm15 = vweird.f32 %v3114_v11 }
  0xc5   : > { %v2463_v23 = vpop.eup %2462  ;;  %v1288_v50 = vmul.f32 %v1074_v45, %v2945_v12  ;;  %v3137_v51 = vadd.f32 1.0, %v2461_v31  ;;  %2470 = vpow2.f32 %v733_v37  ;;  %vm3148_vm0 = vcmp.eq.f32.partialorder %v1899_v46, 8.507059e+37 }
  0xc6   : > { %v2465_v55 = vpop.eup %2464  ;;  %v3140_v57 = vadd.f32 1.0, %v2463_v23  ;;  %v1902_v63 = vor.u32 1.1754944e-38, %v1901_v47  ;;  %v862_v3 = vand.u32 2147483648, %v3126_v33  ;;  %vm856_vm2 = vweird.f32 %v3126_v33 }
  0xc7   : > { %1320 = vst.msk [vmem:[%s3025_s27 + $0x88] sm:$0xff] %vm409_vm1, %v1288_v50  ;;  %v1891_v62 = vmul.f32 %v2465_v55, %v3114_v11  ;;  %2472 = vrcp.f32 %v3137_v51  ;;  %v765_v0 = vmul.f32 1.442695, %v714_v60  ;;  %vm1896_vm3 = vweird.f32 %v2465_v55 }
  0xc8   : > { %2474 = vrcp.f32 %v3140_v57  ;;  %vm3156_vm4 = vcmp.eq.f32.partialorder %v860_v27, 8.507059e+37  ;;  %v1689_v6 = vand.u32 2147483647, %v3137_v51  ;;  %v1691_v7 = vand.u32 2147483648, %v3137_v51  ;;  %vm1897_vm7 = vmor %vm1895_vm15, %vm1896_vm3 }
  0xc9   : > { %v2467_v4 = vpop.eup %2466  ;;  %v1892_v53 = vsub.f32 1.0, %v1891_v62  ;;  %2476 = vpow2.f32 %v1562_v52  ;;  %v1084_v49 = vand.u32 2147483647, %v3140_v57  ;;  %v1086_v9 = vand.u32 2147483648, %v3140_v57 }
  0xca   : > { %v2469_v1 = vpop.eup %2468  ;;  %v852_v5 = vmul.f32 %v2467_v4, %v3126_v33  ;;  %v863_v14 = vor.u32 1.1754944e-38, %v862_v3  ;;  %vm1685_vm5 = vweird.f32 %v3137_v51  ;;  %2478 = vpow2.f32 %v765_v0 }
  0xcb   : > { %v2471_v48 = vpop.eup %2470  ;;  %v1893_v41 = vmul.f32 %v2465_v55, %v1892_v53  ;;  %v3164_v10 = vadd.f32 1.0, %v2469_v1  ;;  %vm857_vm6 = vweird.f32 %v2467_v4  ;;  %vm1080_vm8 = vweird.f32 %v3140_v57 }
  0xcc   : > { %v853_v13 = vsub.f32 1.0, %v852_v5  ;;  %v3169_v16 = vadd.f32 1.0, %v2471_v48  ;;  %vm3175_vm9 = vcmp.eq.f32.partialorder %v1689_v6, 8.507059e+37  ;;  %v1692_v25 = vor.u32 1.1754944e-38, %v1691_v7  ;;  %vm858_vm11 = vmor %vm856_vm2, %vm857_vm6  ;;  %v1368_v48 = vpop.f32.mrf.mxu1 }
  0xcd   : > { %v2473_v8 = vpop.eup %2472  ;;  %v1894_v58 = vadd.f32 %v2465_v55, %v1893_v41  ;;  %2480 = vrcp.f32 %v3164_v10  ;;  %v1915_v26 = vand.u32 2147483648, %v3164_v10  ;;  %vm3181_vm10 = vcmp.eq.f32.partialorder %v1084_v49, 8.507059e+37 }
  0xce   : > { %v2475_v18 = vpop.eup %2474  ;;  %v854_v19 = vmul.f32 %v2467_v4, %v853_v13  ;;  %v1681_v59 = vmul.f32 %v2473_v8, %v3137_v51  ;;  %v1087_v11 = vor.u32 1.1754944e-38, %v1086_v9  ;;  %v3186_v42 = vmul.f32 %v2897_v35, %v1413_v15  ;;  %v539_v51 = vpop.f32.mrf.mxu0 }
  0xcf   : > { %v2477_v28 = vpop.eup %2476  ;;  %v1898_v29 = vsel %vm1897_vm7, %v2465_v55, %v1894_v58  ;;  %v1076_v30 = vmul.f32 %v2475_v18, %v3140_v57  ;;  %v1913_v44 = vand.u32 2147483647, %v3164_v10  ;;  %vm1686_vm12 = vweird.f32 %v2473_v8 }
  0xd0   : > { %v1903_v37 = vsel %vm3148_vm0, %v1902_v63, %v1898_v29  ;;  %v855_v39 = vadd.f32 %v2467_v4, %v854_v19  ;;  %v1682_v43 = vsub.f32 1.0, %v1681_v59  ;;  %2482 = vrcp.f32 %v3169_v16  ;;  %v2479_v46 = vpop.eup %2478  ;;  %vm1687_vm0 = vmor %vm1685_vm5, %vm1686_vm12 }
  0xd1   : > { %v2117_v31 = vmul.f32 %v1903_v37, %v2956_v20  ;;  %v1077_v45 = vsub.f32 1.0, %v1076_v30  ;;  %vm1081_vm13 = vweird.f32 %v2475_v18  ;;  %vm1909_vm14 = vweird.f32 %v3164_v10 }
  0xd2   : > { %v859_v47 = vsel %vm858_vm11, %v2467_v4, %v855_v39  ;;  %v1683_v23 = vmul.f32 %v2473_v8, %v1682_v43  ;;  %v1916_v50 = vor.u32 1.1754944e-38, %v1915_v26  ;;  %v3201_v55 = vadd.f32 1.0, %v2477_v28  ;;  %vm1082_vm3 = vmor %vm1080_vm8, %vm1081_vm13  ;;  %v587_v26 = vpop.f32.mrf.mxu2 }
  0xd3   : > { %v2481_v52 = vpop.eup %2480  ;;  %2149 = vst.msk [vmem:[%s3035_s11 + $0x88] sm:$0xff] %vm409_vm1, %v2117_v31  ;;  %v864_v20 = vsel %vm3156_vm4, %v863_v14, %v859_v47  ;;  %v1078_v33 = vmul.f32 %v2475_v18, %v1077_v45  ;;  %v3203_v27 = vadd.f32 1.0, %v2479_v46  ;;  %vm3207_vm15 = vcmp.eq.f32.partialorder %v1913_v44, 8.507059e+37  ;;  %v1416_v46 = vpop.f32.mrf.mxu3 }
  0xd4   : > { %v1273_v60 = vmul.f32 %v864_v20, %v2962_v24  ;;  %v1684_v62 = vadd.f32 %v2473_v8, %v1683_v23  ;;  %v1905_v12 = vmul.f32 %v2481_v52, %v3164_v10  ;;  %v874_v3 = vand.u32 2147483647, %v3169_v16  ;;  %v1371_v63 = vpop.f32.mrf.mxu1 }
  0xd5   : > { %v1079_v4 = vadd.f32 %v2475_v18, %v1078_v33  ;;  %vm870_vm2 = vweird.f32 %v3169_v16  ;;  %v876_v53 = vand.u32 2147483648, %v3169_v16  ;;  %2484 = vrcp.f32 %v3201_v55 }
  0xd6   : > { %1305 = vst.msk [vmem:[%s3025_s27 + $0x10] sm:$0xff] %vm409_vm1, %v1273_v60  ;;  %v1688_v24 = vsel %vm1687_vm0, %v2473_v8, %v1684_v62  ;;  %v1906_v0 = vsub.f32 1.0, %v1905_v12  ;;  %vm1910_vm4 = vweird.f32 %v2481_v52  ;;  %v1703_v1 = vand.u32 2147483647, %v3201_v55  ;;  %v2483_v5 = vpop.eup %2482  ;;  %v542_v60 = vpop.f32.mrf.mxu0 }
  0xd7   : > { %v1693_v54 = vsel %vm3175_vm9, %v1692_v25, %v1688_v24  ;;  %v1083_v6 = vsel %vm1082_vm3, %v2475_v18, %v1079_v4  ;;  %v1705_v7 = vand.u32 2147483648, %v3201_v55  ;;  %2486 = vrcp.f32 %v3203_v27  ;;  %vm1911_vm7 = vmor %vm1909_vm14, %vm1910_vm4 }
  0xd8   : > { %v2102_v57 = vmul.f32 %v1693_v54, %v3083_v2  ;;  %v1088_v41 = vsel %vm3181_vm10, %v1087_v11, %v1083_v6  ;;  %v1907_v49 = vmul.f32 %v2481_v52, %v1906_v0  ;;  %v866_v9 = vmul.f32 %v2483_v5, %v3169_v16 }
  0xd9   : > { %vm3232_vm5 = vcmp.eq.f32.partialorder %v874_v3, 8.507059e+37  ;;  %v1289_v14 = vmul.f32 %v1088_v41, %v3087_v56  ;;  %vm871_vm6 = vweird.f32 %v2483_v5  ;;  %v877_v15 = vor.u32 1.1754944e-38, %v876_v53 }
  0xda   : > { %vm1699_vm8 = vweird.f32 %v3201_v55  ;;  %2134 = vst.msk [vmem:[%s3035_s11 + $0x10] sm:$0xff] %vm409_vm1, %v2102_v57  ;;  %v1908_v8 = vadd.f32 %v2481_v52, %v1907_v49  ;;  %v867_v2 = vsub.f32 1.0, %v866_v9  ;;  %v1706_v58 = vor.u32 1.1754944e-38, %v1705_v7  ;;  %vm872_vm13 = vmor %vm870_vm2, %vm871_vm6  ;;  %v590_v41 = vpop.f32.mrf.mxu2 }
  0xdb   : > { %v1098_v18 = vand.u32 2147483647, %v3203_v27  ;;  %v2485_v19 = vpop.eup %2484  ;;  %1321 = vst.msk [vmem:[%s3025_s27 + $0x90] sm:$0xff] %vm409_vm1, %v1289_v14  ;;  %v1100_v56 = vand.u32 2147483648, %v3203_v27  ;;  %v3249_v59 = vadd.f32 %v2907_v38, %v3186_v42  ;;  %v631_v22 = vmul.f32 %v2892_v34, %v539_v51 }
  0xdc   : > { %v1460_v25 = vmul.f32 %v2897_v35, %v1368_v48  ;;  %v1912_v28 = vsel %vm1911_vm7, %v2481_v52, %v1908_v8  ;;  %v868_v29 = vmul.f32 %v2483_v5, %v867_v2  ;;  %v1695_v30 = vmul.f32 %v2485_v19, %v3201_v55 }
  0xdd   : > { %vm3254_vm9 = vcmp.eq.f32.partialorder %v1703_v1, 8.507059e+37  ;;  %vm1094_vm10 = vweird.f32 %v3203_v27  ;;  %v2487_v10 = vpop.eup %2486  ;;  %v1917_v11 = vsel %vm3207_vm15, %v1916_v50, %v1912_v28  ;;  %vm1700_vm11 = vweird.f32 %v2485_v19 }
  0xde   : > { %v1101_v42 = vor.u32 1.1754944e-38, %v1100_v56  ;;  %v1543_v37 = vsub.f32 0.0, %v3249_v59  ;;  %v2118_v39 = vmul.f32 %v1917_v11, %v3105_v17  ;;  %v869_v43 = vadd.f32 %v2483_v5, %v868_v29  ;;  %vm1701_vm15 = vmor %vm1699_vm8, %vm1700_vm11 }
  0xdf   : > { %v1696_v44 = vsub.f32 1.0, %v1695_v30  ;;  %v1090_v31 = vmul.f32 %v2487_v10, %v3203_v27  ;;  %vm3264_vm12 = vcmp.eq.f32.partialorder %v1098_v18, 8.507059e+37  ;;  %vm1095_vm14 = vweird.f32 %v2487_v10 }
  0xe0   : > { %v1594_v47 = vmul.f32 1.442695, %v1543_v37  ;;  %v3272_v23 = vadd.f32 %v2902_v36, %v631_v22  ;;  %v3275_v17 = vadd.f32 %v2907_v38, %v1460_v25  ;;  %2150 = vst.msk [vmem:[%s3035_s11 + $0x90] sm:$0xff] %vm409_vm1, %v2118_v39  ;;  %v873_v50 = vsel %vm872_vm13, %v2483_v5, %v869_v43  ;;  %vm1096_vm0 = vmor %vm1094_vm10, %vm1095_vm14 }
  0xe1   : > { %v1697_v52 = vmul.f32 %v2485_v19, %v1696_v44  ;;  %v1091_v20 = vsub.f32 1.0, %v1090_v31  ;;  %v647_v33 = vmul.f32 %v2892_v34, %v587_v26  ;;  %v878_v16 = vsel %vm3232_vm5, %v877_v15, %v873_v50 }
  0xe2   : > { %2488 = vpow2.f32 %v1594_v47  ;;  %v699_v62 = vsub.f32 0.0, %v3272_v23  ;;  %v1528_v12 = vsub.f32 0.0, %v3275_v17  ;;  %v1274_v3 = vmul.f32 %v878_v16, %v3111_v21 }
  0xe3   : > { %v1698_v4 = vadd.f32 %v2485_v19, %v1697_v52  ;;  %v1092_v53 = vmul.f32 %v2487_v10, %v1091_v20  ;;  %v3286_v24 = vadd.f32 %v2902_v36, %v647_v33  ;;  %v1476_v51 = vmul.f32 %v2897_v35, %v1416_v46 }
  0xe4   : > { %v735_v0 = vmul.f32 1.442695, %v699_v62  ;;  %v1564_v1 = vmul.f32 1.442695, %v1528_v12  ;;  %v632_v5 = vmul.f32 %v2892_v34, %v542_v60  ;;  %1306 = vst.msk [vmem:[%s3025_s27 + $0x18] sm:$0xff] %vm409_vm1, %v1274_v3  ;;  %v1461_v7 = vmul.f32 %v2897_v35, %v1371_v63 }
  0xe5   : > { %v1702_v54 = vsel %vm1701_vm15, %v2485_v19, %v1698_v4  ;;  %v1093_v6 = vadd.f32 %v2487_v10, %v1092_v53  ;;  %v715_v21 = vsub.f32 0.0, %v3286_v24  ;;  %v3303_v55 = vadd.f32 %v2907_v38, %v1476_v51  ;;  %v1419_v19 = vpop.f32.mrf.mxu3 }
  0xe6   : > { %v1707_v48 = vsel %vm3254_vm9, %v1706_v58, %v1702_v54  ;;  %2490 = vpow2.f32 %v735_v0  ;;  %v3306_v57 = vadd.f32 %v2902_v36, %v632_v5  ;;  %v3314_v2 = vadd.f32 %v2907_v38, %v1461_v7 }
  0xe7   : > { %v2103_v49 = vmul.f32 %v1707_v48, %v3122_v61  ;;  %v1097_v9 = vsel %vm1096_vm0, %v2487_v10, %v1093_v6  ;;  %2492 = vpow2.f32 %v1564_v1  ;;  %v767_v13 = vmul.f32 1.442695, %v715_v21 }
  0xe8   : > { %v2489_v14 = vpop.eup %2488  ;;  %v1102_v15 = vsel %vm3264_vm12, %v1101_v42, %v1097_v9  ;;  %v1544_v27 = vsub.f32 0.0, %v3303_v55  ;;  %v700_v8 = vsub.f32 0.0, %v3306_v57  ;;  %v648_v18 = vmul.f32 %v2892_v34, %v590_v41 }
  0xe9   : > { %2135 = vst.msk [vmem:[%s3035_s11 + $0x18] sm:$0xff] %vm409_vm1, %v2103_v49  ;;  %v1290_v58 = vmul.f32 %v1102_v15, %v3131_v40  ;;  %v3319_v61 = vadd.f32 1.0, %v2489_v14  ;;  %2494 = vpow2.f32 %v767_v13  ;;  %v1529_v25 = vsub.f32 0.0, %v3314_v2 }
  0xea   : > { %v1596_v56 = vmul.f32 1.442695, %v1544_v27  ;;  %v737_v22 = vmul.f32 1.442695, %v700_v8  ;;  %v3327_v29 = vadd.f32 %v2902_v36, %v648_v18  ;;  %v1477_v40 = vmul.f32 %v2897_v35, %v1419_v19 }
  0xeb   : > { %1322 = vst.msk [vmem:[%s3025_s27 + $0x98] sm:$0xff] %vm409_vm1, %v1290_v58  ;;  %2496 = vrcp.f32 %v3319_v61  ;;  %v1566_v28 = vmul.f32 1.442695, %v1529_v25  ;;  %v1927_v34 = vand.u32 2147483647, %v3319_v61  ;;  %v1929_v10 = vand.u32 2147483648, %v3319_v61 }
  0xec   : > { %v2491_v26 = vpop.eup %2490  ;;  %2498 = vpow2.f32 %v1596_v56  ;;  %v716_v37 = vsub.f32 0.0, %v3327_v29  ;;  %v3340_v35 = vadd.f32 %v2907_v38, %v1477_v40  ;;  %vm1923_vm2 = vweird.f32 %v3319_v61 }
  0xed   : > { %v2493_v30 = vpop.eup %2492  ;;  %v3330_v32 = vadd.f32 1.0, %v2491_v26  ;;  %2500 = vpow2.f32 %v737_v22  ;;  %vm3347_vm3 = vcmp.eq.f32.partialorder %v1927_v34, 8.507059e+37  ;;  %v1930_v46 = vor.u32 1.1754944e-38, %v1929_v10 }
  0xee   : > { %v3334_v11 = vadd.f32 1.0, %v2493_v30  ;;  %2502 = vpow2.f32 %v1566_v28  ;;  %v769_v33 = vmul.f32 1.442695, %v716_v37  ;;  %v1545_v63 = vsub.f32 0.0, %v3340_v35 }
  0xef   : > { %v2495_v42 = vpop.eup %2494  ;;  %2504 = vrcp.f32 %v3330_v32  ;;  %v890_v39 = vand.u32 2147483648, %v3330_v32  ;;  %v888_v47 = vand.u32 2147483647, %v3330_v32  ;;  %vm884_vm5 = vweird.f32 %v3330_v32 }
  0xf0   : > { %2506 = vrcp.f32 %v3334_v11  ;;  %v3344_v43 = vadd.f32 1.0, %v2495_v42  ;;  %v1717_v38 = vand.u32 2147483647, %v3334_v11  ;;  %v1719_v52 = vand.u32 2147483648, %v3334_v11 }
  0xf1   : > { %v2497_v36 = vpop.eup %2496  ;;  %v891_v4 = vor.u32 1.1754944e-38, %v890_v39  ;;  %vm1713_vm6 = vweird.f32 %v3334_v11  ;;  %vm3364_vm8 = vcmp.eq.f32.partialorder %v888_v47, 8.507059e+37  ;;  %v1598_v15 = vmul.f32 1.442695, %v1545_v63  ;;  %v545_v39 = vpop.f32.mrf.mxu0 }
  0xf2   : > { %v2499_v44 = vpop.eup %2498  ;;  %v1919_v31 = vmul.f32 %v2497_v36, %v3319_v61  ;;  %2508 = vrcp.f32 %v3344_v43  ;;  %v1114_v20 = vand.u32 2147483648, %v3344_v43  ;;  %vm1924_vm4 = vweird.f32 %v2497_v36  ;;  %v1374_v63 = vpop.f32.mrf.mxu1 }
  0xf3   : > { %v2501_v50 = vpop.eup %2500  ;;  %v3356_v62 = vadd.f32 1.0, %v2499_v44  ;;  %v1112_v5 = vand.u32 2147483647, %v3344_v43  ;;  %vm3371_vm7 = vcmp.eq.f32.partialorder %v1717_v38, 8.507059e+37  ;;  %v1720_v21 = vor.u32 1.1754944e-38, %v1719_v52  ;;  %vm1925_vm10 = vmor %vm1923_vm2, %vm1924_vm4 }
  0xf4   : > { %v2503_v60 = vpop.eup %2502  ;;  %v1920_v16 = vsub.f32 1.0, %v1919_v31  ;;  %v3358_v12 = vadd.f32 1.0, %v2501_v50  ;;  %v3375_v7 = vor.u32 1.1754944e-38, %v1114_v20  ;;  %vm1108_vm9 = vweird.f32 %v3344_v43 }
  0xf5   : > { %v2505_v3 = vpop.eup %2504  ;;  %2510 = vrcp.f32 %v3356_v62  ;;  %v3379_v49 = vadd.f32 1.0, %v2503_v60  ;;  %v1941_v14 = vand.u32 2147483647, %v3356_v62  ;;  %vm3386_vm12 = vcmp.eq.f32.partialorder %v1112_v5, 8.507059e+37 }
  0xf6   : > { %v2507_v53 = vpop.eup %2506  ;;  %v1921_v0 = vmul.f32 %v2497_v36, %v1920_v16  ;;  %v880_v1 = vmul.f32 %v2505_v3, %v3330_v32  ;;  %2512 = vpow2.f32 %v769_v33  ;;  %vm885_vm11 = vweird.f32 %v2505_v3 }
  0xf7   : > { %v1709_v54 = vmul.f32 %v2507_v53, %v3334_v11  ;;  %2514 = vrcp.f32 %v3358_v12  ;;  %v1943_v19 = vand.u32 2147483648, %v3356_v62  ;;  %vm1714_vm13 = vweird.f32 %v2507_v53  ;;  %vm886_vm0 = vmor %vm884_vm5, %vm885_vm11 }
  0xf8   : > { %v1922_v48 = vadd.f32 %v2497_v36, %v1921_v0  ;;  %v881_v41 = vsub.f32 1.0, %v880_v1  ;;  %v2509_v9 = vpop.eup %2508  ;;  %vm1937_vm14 = vweird.f32 %v3356_v62  ;;  %vm898_vm15 = vweird.f32 %v3358_v12 }
  0xf9   : > { %v1710_v13 = vsub.f32 1.0, %v1709_v54  ;;  %v1104_v58 = vmul.f32 %v2509_v9, %v3344_v43  ;;  %vm3400_vm2 = vcmp.eq.f32.partialorder %v1941_v14, 8.507059e+37  ;;  %v902_v42 = vand.u32 2147483647, %v3358_v12  ;;  %v548_v18 = vpop.f32.mrf.mxu0 }
  0xfa   : > { %v1926_v27 = vsel %vm1925_vm10, %v2497_v36, %v1922_v48  ;;  %v882_v8 = vmul.f32 %v2505_v3, %v881_v41  ;;  %2516 = vrcp.f32 %v3379_v49  ;;  %vm1109_vm4 = vweird.f32 %v2509_v9  ;;  %v3453_v41 = vld [vmem:[%s4421_s2] ss:$0 sm:$0xff] }
  0xfb   : > { %v1931_v56 = vsel %vm3347_vm3, %v1930_v46, %v1926_v27  ;;  %v1711_v61 = vmul.f32 %v2507_v53, %v1710_v13  ;;  %v2511_v22 = vpop.eup %2510  ;;  %v1105_v28 = vsub.f32 1.0, %v1104_v58  ;;  %vm1715_vm3 = vmor %vm1713_vm6, %vm1714_vm13  ;;  %v1944_v36 = vor.u32 1.1754944e-38, %v1943_v19  ;;  %v1422_v58 = vpop.f32.mrf.mxu3 }
  0xfc   : > { %v2119_v25 = vmul.f32 %v1931_v56, %v3249_v59  ;;  %v883_v26 = vadd.f32 %v2505_v3, %v882_v8  ;;  %v2513_v40 = vpop.eup %2512  ;;  %v1933_v34 = vmul.f32 %v2511_v22, %v3356_v62  ;;  %v904_v50 = vand.u32 2147483648, %v3358_v12  ;;  %vm1110_vm5 = vmor %vm1108_vm9, %vm1109_vm4 }
  0xfd   : > { %v1712_v30 = vadd.f32 %v2507_v53, %v1711_v61  ;;  %v2515_v59 = vpop.eup %2514  ;;  %v1106_v32 = vmul.f32 %v2509_v9, %v1105_v28  ;;  %vm1938_vm6 = vweird.f32 %v2511_v22  ;;  %v3427_v16 = vadd.f32 1.0, %v2513_v40  ;;  %v3474_v61 = vld [vmem:[%s4422_s3] ss:$0 sm:$0xff] }
  0xfe   : > { %2151 = vst.msk [vmem:[%s3035_s11 + $0x98] sm:$0xff] %vm409_vm1, %v2119_v25  ;;  %v887_v37 = vsel %vm886_vm0, %v2505_v3, %v883_v26  ;;  %v1934_v45 = vsub.f32 1.0, %v1933_v34  ;;  %v894_v46 = vmul.f32 %v2515_v59, %v3358_v12  ;;  %2518 = vpow2.f32 %v1598_v15  ;;  %vm1939_vm9 = vmor %vm1937_vm14, %vm1938_vm6  ;;  %v3459_v12 = vld [vmem:[%s4424_s5] ss:$0 sm:$0xff] }
  0xff   : > { %v892_v44 = vsel %vm3364_vm8, %v891_v4, %v887_v37  ;;  %v1716_v31 = vsel %vm1715_vm3, %v2507_v53, %v1712_v30  ;;  %v1107_v11 = vadd.f32 %v2509_v9, %v1106_v32  ;;  %vm3423_vm8 = vcmp.eq.f32.partialorder %v902_v42, 8.507059e+37  ;;  %v593_v53 = vpop.f32.mrf.mxu2  ;;  %v3482_v25 = vld [vmem:[%s4425_s6] ss:$0 sm:$0xff] }
 0x100   : > { %v1275_v47 = vmul.f32 %v892_v44, %v3272_v23  ;;  %v1721_v38 = vsel %vm3371_vm7, %v1720_v21, %v1716_v31  ;;  %v1935_v20 = vmul.f32 %v2511_v22, %v1934_v45  ;;  %v895_v33 = vsub.f32 1.0, %v894_v46  ;;  %v2517_v3 = vpop.eup %2516 }
 0x101   : > { %v2104_v52 = vmul.f32 %v1721_v38, %v3275_v17  ;;  %v1111_v60 = vsel %vm1110_vm5, %v2509_v9, %v1107_v11  ;;  %vm899_vm7 = vweird.f32 %v2515_v59  ;;  %v905_v1 = vor.u32 1.1754944e-38, %v904_v50 }
 0x102   : > { %1307 = vst.msk [vmem:[%s3025_s27 + $0x20] sm:$0xff] %vm409_vm1, %v1275_v47  ;;  %v1116_v17 = vsel %vm3386_vm12, %v3375_v7, %v1111_v60  ;;  %v1936_v43 = vadd.f32 %v2511_v22, %v1935_v20  ;;  %v896_v4 = vmul.f32 %v2515_v59, %v895_v33  ;;  %v1723_v51 = vmul.f32 %v2517_v3, %v3379_v49  ;;  %vm900_vm11 = vmor %vm898_vm15, %vm899_vm7 }
 0x103   : > { %2136 = vst.msk [vmem:[%s3035_s11 + $0x20] sm:$0xff] %vm409_vm1, %v2104_v52  ;;  %v1291_v0 = vmul.f32 %v1116_v17, %v3286_v24  ;;  %vm1727_vm10 = vweird.f32 %v3379_v49  ;;  %v1731_v6 = vand.u32 2147483647, %v3379_v49  ;;  %2520 = vrcp.f32 %v3427_v16 }
 0x104   : > { %v1940_v5 = vsel %vm1939_vm9, %v2511_v22, %v1936_v43  ;;  %v897_v54 = vadd.f32 %v2515_v59, %v896_v4  ;;  %v1724_v62 = vsub.f32 1.0, %v1723_v51  ;;  %vm1728_vm12 = vweird.f32 %v2517_v3  ;;  %v2519_v14 = vpop.eup %2518 }
 0x105   : > { %1323 = vst.msk [vmem:[%s3025_s27 + $0xa0] sm:$0xff] %vm409_vm1, %v1291_v0  ;;  %v1945_v24 = vsel %vm3400_vm2, %v1944_v36, %v1940_v5  ;;  %v1733_v21 = vand.u32 2147483648, %v3379_v49  ;;  %v633_v9 = vmul.f32 %v3453_v41, %v545_v39  ;;  %v1462_v13 = vmul.f32 %v3459_v12, %v1374_v63  ;;  %vm1729_vm14 = vmor %vm1727_vm10, %vm1728_vm12  ;;  %v1377_v39 = vpop.f32.mrf.mxu1 }
 0x106   : > { %v2120_v7 = vmul.f32 %v1945_v24, %v3303_v55  ;;  %v901_v48 = vsel %vm900_vm11, %v2515_v59, %v897_v54  ;;  %v1725_v55 = vmul.f32 %v2517_v3, %v1724_v62  ;;  %v1126_v27 = vand.u32 2147483647, %v3427_v16  ;;  %v1425_v62 = vpop.f32.mrf.mxu3 }
 0x107   : > { %v906_v15 = vsel %vm3423_vm8, %v905_v1, %v901_v48  ;;  %v1128_v8 = vand.u32 2147483648, %v3427_v16  ;;  %v3469_v56 = vadd.f32 1.0, %v2519_v14  ;;  %v3477_v22 = vadd.f32 %v3474_v61, %v633_v9  ;;  %v596_v46 = vpop.f32.mrf.mxu2 }
 0x108   : > { %2152 = vst.msk [vmem:[%s3035_s11 + $0xa0] sm:$0xff] %vm409_vm1, %v2120_v7  ;;  %v1276_v19 = vmul.f32 %v906_v15, %v3306_v57  ;;  %v3485_v26 = vadd.f32 %v3482_v25, %v1462_v13  ;;  %v1726_v28 = vadd.f32 %v2517_v3, %v1725_v55  ;;  %vm3487_vm13 = vcmp.eq.f32.partialorder %v1731_v6, 8.507059e+37 }
 0x109   : > { %v1734_v40 = vor.u32 1.1754944e-38, %v1733_v21  ;;  %v649_v30 = vmul.f32 %v3453_v41, %v593_v53  ;;  %v2521_v34 = vpop.eup %2520  ;;  %vm1122_vm15 = vweird.f32 %v3427_v16  ;;  %2522 = vrcp.f32 %v3469_v56 }
 0x10a   : > { %1308 = vst.msk [vmem:[%s3025_s27 + $0x28] sm:$0xff] %vm409_vm1, %v1276_v19  ;;  %v1478_v10 = vmul.f32 %v3459_v12, %v1422_v58  ;;  %v634_v42 = vmul.f32 %v3453_v41, %v548_v18  ;;  %v1730_v59 = vsel %vm1729_vm14, %v2517_v3, %v1726_v28  ;;  %v1118_v37 = vmul.f32 %v2521_v34, %v3427_v16 }
 0x10b   : > { %vm3502_vm0 = vcmp.eq.f32.partialorder %v1126_v27, 8.507059e+37  ;;  %v1129_v36 = vor.u32 1.1754944e-38, %v1128_v8  ;;  %v701_v49 = vsub.f32 0.0, %v3477_v22  ;;  %v1735_v44 = vsel %vm3487_vm13, %v1734_v40, %v1730_v59 }
 0x10c   : > { %vm1123_vm2 = vweird.f32 %v2521_v34  ;;  %v1955_v31 = vand.u32 2147483647, %v3469_v56  ;;  %v1530_v45 = vsub.f32 0.0, %v3485_v26  ;;  %v2105_v47 = vmul.f32 %v1735_v44, %v3314_v2 }
 0x10d   : > { %v1119_v38 = vsub.f32 1.0, %v1118_v37  ;;  %v739_v11 = vmul.f32 1.442695, %v701_v49  ;;  %v3513_v50 = vadd.f32 %v3474_v61, %v649_v30  ;;  %v3516_v20 = vadd.f32 %v3482_v25, %v1478_v10  ;;  %vm1124_vm3 = vmor %vm1122_vm15, %vm1123_vm2  ;;  %v551_v30 = vpop.f32.mrf.mxu0 }
 0x10e   : > { %v1568_v52 = vmul.f32 1.442695, %v1530_v45  ;;  %v3519_v33 = vadd.f32 %v3474_v61, %v634_v42  ;;  %v1463_v60 = vmul.f32 %v3459_v12, %v1377_v39  ;;  %2137 = vst.msk [vmem:[%s3035_s11 + $0x28] sm:$0xff] %vm409_vm1, %v2105_v47  ;;  %v650_v63 = vmul.f32 %v3453_v41, %v596_v46  ;;  %v1380_v42 = vpop.f32.mrf.mxu1 }
 0x10f   : > { %v1120_v23 = vmul.f32 %v2521_v34, %v1119_v38  ;;  %2524 = vpow2.f32 %v739_v11  ;;  %v717_v2 = vsub.f32 0.0, %v3513_v50  ;;  %v2523_v3 = vpop.eup %2522  ;;  %v1546_v17 = vsub.f32 0.0, %v3516_v20 }
 0x110   : > { %2526 = vpow2.f32 %v1568_v52  ;;  %v702_v43 = vsub.f32 0.0, %v3519_v33  ;;  %v3529_v4 = vadd.f32 %v3482_v25, %v1463_v60  ;;  %v1947_v0 = vmul.f32 %v2523_v3, %v3469_v56 }
 0x111   : > { %v1121_v53 = vadd.f32 %v2521_v34, %v1120_v23  ;;  %v1957_v1 = vand.u32 2147483648, %v3469_v56  ;;  %v771_v51 = vmul.f32 1.442695, %v717_v2  ;;  %v1600_v5 = vmul.f32 1.442695, %v1546_v17 }
 0x112   : > { %v741_v54 = vmul.f32 1.442695, %v702_v43  ;;  %v1531_v6 = vsub.f32 0.0, %v3529_v4  ;;  %v3538_v24 = vadd.f32 %v3474_v61, %v650_v63  ;;  %v1948_v7 = vsub.f32 1.0, %v1947_v0 }
 0x113   : > { %v1125_v21 = vsel %vm1124_vm3, %v2521_v34, %v1121_v53  ;;  %vm1952_vm4 = vweird.f32 %v2523_v3  ;;  %2528 = vpow2.f32 %v771_v51  ;;  %v1479_v55 = vmul.f32 %v3459_v12, %v1425_v62 }
 0x114   : > { %v1130_v48 = vsel %vm3502_vm0, %v1129_v36, %v1125_v21  ;;  %2530 = vpow2.f32 %v1600_v5  ;;  %v1570_v9 = vmul.f32 1.442695, %v1531_v6  ;;  %v718_v16 = vsub.f32 0.0, %v3538_v24 }
 0x115   : > { %v2525_v13 = vpop.eup %2524  ;;  %v1292_v14 = vmul.f32 %v1130_v48, %v3327_v29  ;;  %v1949_v15 = vmul.f32 %v2523_v3, %v1948_v7  ;;  %2532 = vpow2.f32 %v741_v54  ;;  %vm1951_vm5 = vweird.f32 %v3469_v56 }
 0x116   : > { %v2527_v27 = vpop.eup %2526  ;;  %v3545_v8 = vadd.f32 1.0, %v2525_v13  ;;  %2534 = vpow2.f32 %v1570_v9  ;;  %vm1953_vm6 = vmor %vm1951_vm5, %vm1952_vm4  ;;  %v1958_v19 = vor.u32 1.1754944e-38, %v1957_v1  ;;  %v773_v29 = vmul.f32 1.442695, %v718_v16 }
 0x117   : > { %1324 = vst.msk [vmem:[%s3025_s27 + $0xa8] sm:$0xff] %vm409_vm1, %v1292_v14  ;;  %v1950_v58 = vadd.f32 %v2523_v3, %v1949_v15  ;;  %v3550_v18 = vadd.f32 1.0, %v2527_v27  ;;  %vm1956_vm8 = vcmp.eq.f32.partialorder %v1955_v31, 8.507059e+37  ;;  %v3556_v40 = vadd.f32 %v3482_v25, %v1479_v55 }
 0x118   : > { %2536 = vrcp.f32 %v3545_v8  ;;  %v916_v10 = vand.u32 2147483647, %v3545_v8  ;;  %v918_v32 = vand.u32 2147483648, %v3545_v8  ;;  %v3568_v31 = vmul.f32 %v3453_v41, %v551_v30 }
 0x119   : > { %v2529_v28 = vpop.eup %2528  ;;  %v1954_v57 = vsel %vm1953_vm6, %v2523_v3, %v1950_v58  ;;  %2538 = vrcp.f32 %v3550_v18  ;;  %v1745_v39 = vand.u32 2147483647, %v3550_v18  ;;  %v1747_v44 = vand.u32 2147483648, %v3550_v18 }
 0x11a   : > { %v2531_v56 = vpop.eup %2530  ;;  %v1959_v34 = vsel %vm1956_vm8, %v1958_v19, %v1954_v57  ;;  %v3561_v36 = vadd.f32 1.0, %v2529_v28  ;;  %2540 = vpow2.f32 %v773_v29  ;;  %v1547_v46 = vsub.f32 0.0, %v3556_v40 }
 0x11b   : > { %v2533_v59 = vpop.eup %2532  ;;  %v2121_v37 = vmul.f32 %v1959_v34, %v3340_v35  ;;  %v3563_v49 = vadd.f32 1.0, %v2531_v56  ;;  %v3577_v47 = vmul.f32 %v3459_v12, %v1380_v42  ;;  %vm912_vm7 = vweird.f32 %v3545_v8 }
 0x11c   : > { %v2535_v45 = vpop.eup %2534  ;;  %2542 = vrcp.f32 %v3561_v36  ;;  %v3573_v35 = vadd.f32 1.0, %v2533_v59  ;;  %vm1741_vm9 = vweird.f32 %v3550_v18  ;;  %v1142_v11 = vand.u32 2147483648, %v3561_v36 }
 0x11d   : > { %2153 = vst.msk [vmem:[%s3035_s11 + $0xa8] sm:$0xff] %vm409_vm1, %v2121_v37  ;;  %2544 = vrcp.f32 %v3563_v49  ;;  %vm3584_vm10 = vcmp.eq.f32.partialorder %v916_v10, 8.507059e+37  ;;  %v919_v2 = vor.u32 1.1754944e-38, %v918_v32  ;;  %v1971_v63 = vand.u32 2147483648, %v3563_v49 }
 0x11e   : > { %v2537_v38 = vpop.eup %2536  ;;  %vm3590_vm11 = vcmp.eq.f32.partialorder %v1745_v39, 8.507059e+37  ;;  %v1748_v43 = vor.u32 1.1754944e-38, %v1747_v44  ;;  %v1140_v53 = vand.u32 2147483647, %v3561_v36  ;;  %v1969_v1 = vand.u32 2147483647, %v3563_v49 }
 0x11f   : > { %v2539_v52 = vpop.eup %2538  ;;  %v908_v60 = vmul.f32 %v2537_v38, %v3545_v8  ;;  %2546 = vrcp.f32 %v3573_v35  ;;  %v1602_v51 = vmul.f32 1.442695, %v1547_v46  ;;  %vm913_vm12 = vweird.f32 %v2537_v38 }
 0x120   : > { %v1737_v3 = vmul.f32 %v2539_v52, %v3550_v18  ;;  %v2541_v5 = vpop.eup %2540  ;;  %vm1136_vm13 = vweird.f32 %v3561_v36  ;;  %v1143_v6 = vor.u32 1.1754944e-38, %v1142_v11  ;;  %v3598_v62 = vadd.f32 1.0, %v2535_v45  ;;  %vm914_vm4 = vmor %vm912_vm7, %vm913_vm12 }
 0x121   : > { %v909_v0 = vsub.f32 1.0, %v908_v60  ;;  %vm1742_vm14 = vweird.f32 %v2539_v52  ;;  %vm1965_vm15 = vweird.f32 %v3563_v49  ;;  %v1972_v48 = vor.u32 1.1754944e-38, %v1971_v63 }
 0x122   : > { %v1738_v54 = vsub.f32 1.0, %v1737_v3  ;;  %v2543_v21 = vpop.eup %2542  ;;  %v3601_v9 = vadd.f32 1.0, %v2541_v5  ;;  %vm3604_vm0 = vcmp.eq.f32.partialorder %v1140_v53, 8.507059e+37  ;;  %vm926_vm2 = vweird.f32 %v3573_v35  ;;  %vm1743_vm6 = vmor %vm1741_vm9, %vm1742_vm14 }
 0x123   : > { %v910_v7 = vmul.f32 %v2537_v38, %v909_v0  ;;  %v2545_v16 = vpop.eup %2544  ;;  %v1132_v14 = vmul.f32 %v2543_v21, %v3561_v36  ;;  %v930_v55 = vand.u32 2147483647, %v3573_v35  ;;  %vm3611_vm3 = vcmp.eq.f32.partialorder %v1969_v1, 8.507059e+37 }
 0x124   : > { %v1739_v13 = vmul.f32 %v2539_v52, %v1738_v54  ;;  %v1961_v58 = vmul.f32 %v2545_v16, %v3563_v49  ;;  %v932_v29 = vand.u32 2147483648, %v3573_v35  ;;  %2548 = vrcp.f32 %v3598_v62  ;;  %v1428_v54 = vpop.f32.mrf.mxu3 }
 0x125   : > { %v911_v27 = vadd.f32 %v2537_v38, %v910_v7  ;;  %v1133_v57 = vsub.f32 1.0, %v1132_v14  ;;  %vm1137_vm5 = vweird.f32 %v2543_v21  ;;  %2550 = vpow2.f32 %v1602_v51  ;;  %v2547_v30 = vpop.eup %2546 }
 0x126   : > { %v1740_v28 = vadd.f32 %v2539_v52, %v1739_v13  ;;  %v1962_v34 = vsub.f32 1.0, %v1961_v58  ;;  %vm1966_vm8 = vweird.f32 %v2545_v16  ;;  %2552 = vrcp.f32 %v3601_v9  ;;  %vm1138_vm9 = vmor %vm1136_vm13, %vm1137_vm5 }
 0x127   : > { %v915_v56 = vsel %vm914_vm4, %v2537_v38, %v911_v27  ;;  %v1134_v42 = vmul.f32 %v2543_v21, %v1133_v57  ;;  %v922_v59 = vmul.f32 %v2547_v30, %v3573_v35  ;;  %vm3627_vm7 = vcmp.eq.f32.partialorder %v930_v55, 8.507059e+37 }
 0x128   : > { %v920_v10 = vsel %vm3584_vm10, %v919_v2, %v915_v56  ;;  %v1744_v8 = vsel %vm1743_vm6, %v2539_v52, %v1740_v28  ;;  %v1963_v39 = vmul.f32 %v2545_v16, %v1962_v34  ;;  %v1759_v44 = vand.u32 2147483647, %v3598_v62  ;;  %v554_v28 = vpop.f32.mrf.mxu0  ;;  %v1383_v56 = vpop.f32.mrf.mxu1 }
 0x129   : > { %v1277_v32 = vmul.f32 %v920_v10, %v3477_v22  ;;  %v1749_v18 = vsel %vm3590_vm11, %v1748_v43, %v1744_v8  ;;  %v1135_v46 = vadd.f32 %v2543_v21, %v1134_v42  ;;  %v923_v38 = vsub.f32 1.0, %v922_v59  ;;  %vm1967_vm11 = vmor %vm1965_vm15, %vm1966_vm8 }
 0x12a   : > { %v2106_v45 = vmul.f32 %v1749_v18, %v3485_v26  ;;  %v3638_v11 = vadd.f32 %v3474_v61, %v3568_v31  ;;  %v2549_v52 = vpop.eup %2548  ;;  %v1964_v22 = vadd.f32 %v2545_v16, %v1963_v39  ;;  %v933_v60 = vor.u32 1.1754944e-38, %v932_v29  ;;  %v599_v26 = vpop.f32.mrf.mxu2 }
 0x12b   : > { %1309 = vst.msk [vmem:[%s3025_s27 + $0x30] sm:$0xff] %vm409_vm1, %v1277_v32  ;;  %vm1755_vm10 = vweird.f32 %v3598_v62  ;;  %v1761_v23 = vand.u32 2147483648, %v3598_v62  ;;  %v2551_v2 = vpop.eup %2550  ;;  %v1139_v63 = vsel %vm1138_vm9, %v2543_v21, %v1135_v46  ;;  %v924_v31 = vmul.f32 %v2547_v30, %v923_v38 }
 0x12c   : > { %2138 = vst.msk [vmem:[%s3035_s11 + $0x30] sm:$0xff] %vm409_vm1, %v2106_v45  ;;  %vm927_vm12 = vweird.f32 %v2547_v30  ;;  %v1751_v36 = vmul.f32 %v2549_v52, %v3598_v62  ;;  %v2553_v3 = vpop.eup %2552  ;;  %v1144_v17 = vsel %vm3604_vm0, %v1143_v6, %v1139_v63  ;;  %v1968_v43 = vsel %vm1967_vm11, %v2545_v16, %v1964_v22  ;;  %v1431_v38 = vpop.f32.mrf.mxu3 }
 0x12d   : > { %vm3655_vm13 = vcmp.eq.f32.partialorder %v1759_v44, 8.507059e+37  ;;  %v1154_v0 = vand.u32 2147483647, %v3601_v9  ;;  %v1293_v49 = vmul.f32 %v1144_v17, %v3513_v50  ;;  %v1973_v1 = vsel %vm3611_vm3, %v1972_v48, %v1968_v43  ;;  %vm928_vm14 = vmor %vm926_vm2, %vm927_vm12 }
 0x12e   : > { %v925_v51 = vadd.f32 %v2547_v30, %v924_v31  ;;  %v1752_v5 = vsub.f32 1.0, %v1751_v36  ;;  %v2122_v21 = vmul.f32 %v1973_v1, %v3516_v20  ;;  %vm1756_vm15 = vweird.f32 %v2549_v52 }
 0x12f   : > { %v1146_v6 = vmul.f32 %v2553_v3, %v3601_v9  ;;  %v1156_v7 = vand.u32 2147483648, %v3601_v9  ;;  %1325 = vst.msk [vmem:[%s3025_s27 + $0xb0] sm:$0xff] %vm409_vm1, %v1293_v49  ;;  %v3670_v13 = vadd.f32 1.0, %v2551_v2  ;;  %v703_v48 = vsub.f32 0.0, %v3638_v11  ;;  %vm1757_vm0 = vmor %vm1755_vm10, %vm1756_vm15 }
 0x130   : > { %v929_v16 = vsel %vm928_vm14, %v2547_v30, %v925_v51  ;;  %v1753_v50 = vmul.f32 %v2549_v52, %v1752_v5  ;;  %2154 = vst.msk [vmem:[%s3035_s11 + $0xb0] sm:$0xff] %vm409_vm1, %v2122_v21  ;;  %v3679_v14 = vadd.f32 %v3482_v25, %v3577_v47  ;;  %v651_v15 = vmul.f32 %v3453_v41, %v599_v26  ;;  %v557_v51 = vpop.f32.mrf.mxu0 }
 0x131   : > { %v934_v20 = vsel %vm3627_vm7, %v933_v60, %v929_v16  ;;  %v1147_v35 = vsub.f32 1.0, %v1146_v6  ;;  %v1762_v58 = vor.u32 1.1754944e-38, %v1761_v23  ;;  %2554 = vrcp.f32 %v3670_v13 }
 0x132   : > { %v1278_v55 = vmul.f32 %v934_v20, %v3519_v33  ;;  %v1754_v27 = vadd.f32 %v2549_v52, %v1753_v50  ;;  %vm1150_vm2 = vweird.f32 %v3601_v9  ;;  %vm1151_vm3 = vweird.f32 %v2553_v3  ;;  %v602_v8 = vpop.f32.mrf.mxu2 }
 0x133   : > { %v1148_v19 = vmul.f32 %v2553_v3, %v1147_v35  ;;  %v743_v29 = vmul.f32 1.442695, %v703_v48  ;;  %v1532_v57 = vsub.f32 0.0, %v3679_v14  ;;  %v3692_v33 = vadd.f32 %v3474_v61, %v651_v15  ;;  %vm1152_vm5 = vmor %vm1150_vm2, %vm1151_vm3 }
 0x134   : > { %1310 = vst.msk [vmem:[%s3025_s27 + $0x38] sm:$0xff] %vm409_vm1, %v1278_v55  ;;  %v1758_v47 = vsel %vm1757_vm0, %v2549_v52, %v1754_v27  ;;  %v1480_v30 = vmul.f32 %v3459_v12, %v1428_v54  ;;  %vm1155_vm4 = vcmp.eq.f32.partialorder %v1154_v0, 8.507059e+37  ;;  %v1157_v10 = vor.u32 1.1754944e-38, %v1156_v7  ;;  %v1386_v55 = vpop.f32.mrf.mxu1 }
 0x135   : > { %v1763_v62 = vsel %vm3655_vm13, %v1762_v58, %v1758_v47  ;;  %v1149_v34 = vadd.f32 %v2553_v3, %v1148_v19  ;;  %2556 = vpow2.f32 %v743_v29  ;;  %v1572_v59 = vmul.f32 1.442695, %v1532_v57 }
 0x136   : > { %v2107_v42 = vmul.f32 %v1763_v62, %v3529_v4  ;;  %v719_v37 = vsub.f32 0.0, %v3692_v33  ;;  %v3703_v18 = vadd.f32 %v3482_v25, %v1480_v30  ;;  %v636_v39 = vmul.f32 %v3453_v41, %v554_v28 }
 0x137   : > { %v1153_v32 = vsel %vm1152_vm5, %v2553_v3, %v1149_v34  ;;  %v1465_v44 = vmul.f32 %v3459_v12, %v1383_v56  ;;  %v2555_v45 = vpop.eup %2554  ;;  %2558 = vpow2.f32 %v1572_v59  ;;  %v652_v46 = vmul.f32 %v3453_v41, %v602_v8 }
 0x138   : > { %2139 = vst.msk [vmem:[%s3035_s11 + $0x38] sm:$0xff] %vm409_vm1, %v2107_v42  ;;  %v1158_v4 = vsel %vm1155_vm4, %v1157_v10, %v1153_v32  ;;  %v775_v9 = vmul.f32 1.442695, %v719_v37  ;;  %v1975_v22 = vmul.f32 %v2555_v45, %v3670_v13  ;;  %v1548_v60 = vsub.f32 0.0, %v3703_v18 }
 0x139   : > { %v1294_v52 = vmul.f32 %v1158_v4, %v3538_v24  ;;  %v3714_v23 = vadd.f32 %v3474_v61, %v636_v39  ;;  %v3717_v26 = vadd.f32 %v3482_v25, %v1465_v44  ;;  %v3720_v2 = vadd.f32 %v3474_v61, %v652_v46 }
 0x13a   : > { %2560 = vpow2.f32 %v775_v9  ;;  %v1976_v63 = vsub.f32 1.0, %v1975_v22  ;;  %v1983_v31 = vand.u32 2147483647, %v3670_v13  ;;  %v1604_v24 = vmul.f32 1.442695, %v1548_v60 }
 0x13b   : > { %1326 = vst.msk [vmem:[%s3025_s27 + $0xb8] sm:$0xff] %vm409_vm1, %v1294_v52  ;;  %v1481_v36 = vmul.f32 %v3459_v12, %v1431_v38  ;;  %v2557_v3 = vpop.eup %2556  ;;  %vm1980_vm6 = vweird.f32 %v2555_v45  ;;  %v1985_v17 = vand.u32 2147483648, %v3670_v13  ;;  %v704_v43 = vsub.f32 0.0, %v3714_v23 }
 0x13c   : > { %v1533_v53 = vsub.f32 0.0, %v3717_v26  ;;  %v1977_v0 = vmul.f32 %v2555_v45, %v1976_v63  ;;  %v3729_v49 = vadd.f32 1.0, %v2557_v3  ;;  %2562 = vpow2.f32 %v1604_v24 }
 0x13d   : > { %v720_v1 = vsub.f32 0.0, %v3720_v2  ;;  %v2559_v5 = vpop.eup %2558  ;;  %vm1979_vm8 = vweird.f32 %v3670_v13  ;;  %v745_v54 = vmul.f32 1.442695, %v704_v43  ;;  %vm1984_vm7 = vcmp.eq.f32.partialorder %v1983_v31, 8.507059e+37 }
 0x13e   : > { %v1574_v21 = vmul.f32 1.442695, %v1533_v53  ;;  %v1978_v6 = vadd.f32 %v2555_v45, %v1977_v0  ;;  %2564 = vrcp.f32 %v3729_v49  ;;  %v3735_v7 = vadd.f32 %v3482_v25, %v1481_v36  ;;  %vm1981_vm9 = vmor %vm1979_vm8, %vm1980_vm6 }
 0x13f   : > { %v1986_v50 = vor.u32 1.1754944e-38, %v1985_v17  ;;  %v3738_v48 = vadd.f32 1.0, %v2559_v5  ;;  %2566 = vpow2.f32 %v745_v54  ;;  %v637_v20 = vmul.f32 %v3453_v41, %v557_v51 }
 0x140   : > { %v2561_v16 = vpop.eup %2560  ;;  %v1982_v35 = vsel %vm1981_vm9, %v2555_v45, %v1978_v6  ;;  %2568 = vpow2.f32 %v1574_v21  ;;  %v777_v15 = vmul.f32 1.442695, %v720_v1  ;;  %v944_v58 = vand.u32 2147483647, %v3729_v49 }
 0x141   : > { %v3741_v13 = vadd.f32 1.0, %v2561_v16  ;;  %v1987_v27 = vsel %vm1984_vm7, %v1986_v50, %v1982_v35  ;;  %v946_v19 = vand.u32 2147483648, %v3729_v49  ;;  %2570 = vrcp.f32 %v3738_v48  ;;  %v1389_v35 = vpop.f32.mrf.mxu1 }
 0x142   : > { %v2563_v29 = vpop.eup %2562  ;;  %v2123_v28 = vmul.f32 %v1987_v27, %v3556_v40  ;;  %v1549_v47 = vsub.f32 0.0, %v3735_v7  ;;  %v3752_v30 = vmul.f32 %v3459_v12, %v1386_v55  ;;  %vm940_vm10 = vweird.f32 %v3729_v49 }
 0x143   : > { %2572 = vrcp.f32 %v3741_v13  ;;  %v3749_v57 = vadd.f32 1.0, %v2563_v29  ;;  %v1773_v62 = vand.u32 2147483647, %v3738_v48  ;;  %v1775_v34 = vand.u32 2147483648, %v3738_v48 }
 0x144   : > { %v2565_v56 = vpop.eup %2564  ;;  %2155 = vst.msk [vmem:[%s3035_s11 + $0xb8] sm:$0xff] %vm409_vm1, %v2123_v28  ;;  %v3760_v40 = vadd.f32 %v3474_v61, %v637_v20  ;;  %vm3763_vm11 = vcmp.eq.f32.partialorder %v944_v58, 8.507059e+37  ;;  %v947_v59 = vor.u32 1.1754944e-38, %v946_v19  ;;  %v1168_v37 = vand.u32 2147483647, %v3741_v13 }
 0x145   : > { %v2567_v10 = vpop.eup %2566  ;;  %v936_v8 = vmul.f32 %v2565_v56, %v3729_v49  ;;  %2574 = vpow2.f32 %v777_v15  ;;  %vm1769_vm12 = vweird.f32 %v3738_v48  ;;  %v1170_v39 = vand.u32 2147483648, %v3741_v13 }
 0x146   : > { %v2569_v32 = vpop.eup %2568  ;;  %2576 = vrcp.f32 %v3749_v57  ;;  %v1606_v44 = vmul.f32 1.442695, %v1549_v47  ;;  %vm1164_vm13 = vweird.f32 %v3741_v13  ;;  %v1999_v9 = vand.u32 2147483648, %v3749_v57 }
 0x147   : > { %v2571_v45 = vpop.eup %2570  ;;  %v937_v4 = vsub.f32 1.0, %v936_v8  ;;  %v3773_v46 = vadd.f32 1.0, %v2567_v10  ;;  %v3775_v38 = vadd.f32 1.0, %v2569_v32  ;;  %vm941_vm14 = vweird.f32 %v2565_v56 }
 0x148   : > { %v1765_v22 = vmul.f32 %v2571_v45, %v3738_v48  ;;  %vm3778_vm15 = vcmp.eq.f32.partialorder %v1773_v62, 8.507059e+37  ;;  %v1776_v63 = vor.u32 1.1754944e-38, %v1775_v34  ;;  %vm3783_vm0 = vcmp.eq.f32.partialorder %v1168_v37, 8.507059e+37  ;;  %vm942_vm4 = vmor %vm940_vm10, %vm941_vm14  ;;  %v3820_v48 = vpop.f32.mrf.mxu2 }
 0x149   : > { %v2573_v52 = vpop.eup %2572  ;;  %v938_v31 = vmul.f32 %v2565_v56, %v937_v4  ;;  %v1997_v3 = vand.u32 2147483647, %v3749_v57  ;;  %2578 = vrcp.f32 %v3773_v46  ;;  %vm1770_vm2 = vweird.f32 %v2571_v45 }
 0x14a   : > { %v1160_v24 = vmul.f32 %v2573_v52, %v3741_v13  ;;  %v1766_v17 = vsub.f32 1.0, %v1765_v22  ;;  %v1171_v43 = vor.u32 1.1754944e-38, %v1170_v39  ;;  %2580 = vpow2.f32 %v1606_v44  ;;  %vm1771_vm9 = vmor %vm1769_vm12, %vm1770_vm2 }
 0x14b   : > { %v2575_v53 = vpop.eup %2574  ;;  %v939_v0 = vadd.f32 %v2565_v56, %v938_v31  ;;  %vm1993_vm3 = vweird.f32 %v3749_v57  ;;  %v2000_v51 = vor.u32 1.1754944e-38, %v1999_v9  ;;  %2582 = vrcp.f32 %v3775_v38 }
 0x14c   : > { %v1161_v1 = vsub.f32 1.0, %v1160_v24  ;;  %v2577_v5 = vpop.eup %2576  ;;  %v1767_v54 = vmul.f32 %v2571_v45, %v1766_v17  ;;  %vm1165_vm5 = vweird.f32 %v2573_v52  ;;  %v958_v21 = vand.u32 2147483647, %v3773_v46 }
 0x14d   : > { %v960_v6 = vand.u32 2147483648, %v3773_v46  ;;  %v943_v16 = vsel %vm942_vm4, %v2565_v56, %v939_v0  ;;  %v1989_v20 = vmul.f32 %v2577_v5, %v3749_v57  ;;  %vm3797_vm6 = vcmp.eq.f32.partialorder %v1997_v3, 8.507059e+37  ;;  %vm1166_vm10 = vmor %vm1164_vm13, %vm1165_vm5 }
 0x14e   : > { %v1162_v50 = vmul.f32 %v2573_v52, %v1161_v1  ;;  %vm954_vm8 = vweird.f32 %v3773_v46  ;;  %v948_v49 = vsel %vm3763_vm11, %v947_v59, %v943_v16  ;;  %v1768_v15 = vadd.f32 %v2571_v45, %v1767_v54 }
 0x14f   : > { %vm1783_vm7 = vweird.f32 %v3775_v38  ;;  %v1787_v55 = vand.u32 2147483647, %v3775_v38  ;;  %v2579_v27 = vpop.eup %2578  ;;  %v1279_v58 = vmul.f32 %v948_v49, %v3638_v11  ;;  %v1990_v29 = vsub.f32 1.0, %v1989_v20 }
 0x150   : > { %v1163_v19 = vadd.f32 %v2573_v52, %v1162_v50  ;;  %v3810_v28 = vadd.f32 1.0, %v2575_v53  ;;  %v2581_v47 = vpop.eup %2580  ;;  %v1772_v56 = vsel %vm1771_vm9, %v2571_v45, %v1768_v15  ;;  %vm1994_vm11 = vweird.f32 %v2577_v5  ;;  %v608_v49 = vpop.f32.mrf.mxu2 }
 0x151   : > { %v950_v62 = vmul.f32 %v2579_v27, %v3773_v46  ;;  %vm3816_vm14 = vcmp.eq.f32.partialorder %v958_v21, 8.507059e+37  ;;  %v961_v11 = vor.u32 1.1754944e-38, %v960_v6  ;;  %v2583_v10 = vpop.eup %2582  ;;  %1311 = vst.msk [vmem:[%s3025_s27 + $0x40] sm:$0xff] %vm409_vm1, %v1279_v58  ;;  %v1777_v8 = vsel %vm3778_vm15, %v1776_v63, %v1772_v56  ;;  %vm1995_vm15 = vmor %vm1993_vm3, %vm1994_vm11  ;;  %v560_v21 = vpop.f32.mrf.mxu0 }
 0x152   : > { %v1167_v42 = vsel %vm1166_vm10, %v2573_v52, %v1163_v19  ;;  %v1991_v13 = vmul.f32 %v2577_v5, %v1990_v29  ;;  %2584 = vrcp.f32 %v3810_v28  ;;  %v2108_v59 = vmul.f32 %v1777_v8, %v3679_v14  ;;  %v1434_v52 = vpop.f32.mrf.mxu3 }
 0x153   : > { %v1172_v37 = vsel %vm3783_vm0, %v1171_v43, %v1167_v42  ;;  %v951_v32 = vsub.f32 1.0, %v950_v62  ;;  %v1779_v39 = vmul.f32 %v2583_v10, %v3775_v38  ;;  %vm3831_vm12 = vcmp.eq.f32.partialorder %v1787_v55, 8.507059e+37 }
 0x154   : > { %v1295_v45 = vmul.f32 %v1172_v37, %v3692_v33  ;;  %v1992_v4 = vadd.f32 %v2577_v5, %v1991_v13  ;;  %vm955_vm13 = vweird.f32 %v2579_v27  ;;  %v1789_v9 = vand.u32 2147483648, %v3775_v38  ;;  %2140 = vst.msk [vmem:[%s3035_s11 + $0x40] sm:$0xff] %vm409_vm1, %v2108_v59 }
 0x155   : > { %v952_v14 = vmul.f32 %v2579_v27, %v951_v32  ;;  %v1780_v22 = vsub.f32 1.0, %v1779_v39  ;;  %vm1784_vm0 = vweird.f32 %v2583_v10  ;;  %v1182_v60 = vand.u32 2147483647, %v3810_v28  ;;  %vm956_vm2 = vmor %vm954_vm8, %vm955_vm13 }
 0x156   : > { %1327 = vst.msk [vmem:[%s3025_s27 + $0xc0] sm:$0xff] %vm409_vm1, %v1295_v45  ;;  %v1996_v63 = vsel %vm1995_vm15, %v2577_v5, %v1992_v4  ;;  %v1184_v33 = vand.u32 2147483648, %v3810_v28  ;;  %v3846_v31 = vadd.f32 1.0, %v2581_v47  ;;  %v705_v24 = vsub.f32 0.0, %v3760_v40  ;;  %vm1785_vm5 = vmor %vm1783_vm7, %vm1784_vm0 }
 0x157   : > { %v2001_v36 = vsel %vm3797_vm6, %v2000_v51, %v1996_v63  ;;  %v953_v57 = vadd.f32 %v2579_v27, %v952_v14  ;;  %v1781_v3 = vmul.f32 %v2583_v10, %v1780_v22  ;;  %v3853_v17 = vadd.f32 %v3482_v25, %v3752_v30 }
 0x158   : > { %v2585_v43 = vpop.eup %2584  ;;  %v2124_v53 = vmul.f32 %v2001_v36, %v3703_v18  ;;  %v1790_v0 = vor.u32 1.1754944e-38, %v1789_v9  ;;  %vm1178_vm3 = vweird.f32 %v3810_v28  ;;  %2586 = vrcp.f32 %v3846_v31 }
 0x159   : > { %v957_v1 = vsel %vm956_vm2, %v2579_v27, %v953_v57  ;;  %v1782_v51 = vadd.f32 %v2583_v10, %v1781_v3  ;;  %v1174_v5 = vmul.f32 %v2585_v43, %v3810_v28  ;;  %vm3862_vm4 = vcmp.eq.f32.partialorder %v1182_v60, 8.507059e+37  ;;  %v563_v54 = vpop.f32.mrf.mxu0 }
 0x15a   : > { %2156 = vst.msk [vmem:[%s3035_s11 + $0xc0] sm:$0xff] %vm409_vm1, %v2124_v53  ;;  %v962_v18 = vsel %vm3816_vm14, %v961_v11, %v957_v1  ;;  %vm1179_vm6 = vweird.f32 %v2585_v43  ;;  %v1185_v30 = vor.u32 1.1754944e-38, %v1184_v33  ;;  %v747_v46 = vmul.f32 1.442695, %v705_v24  ;;  %v1437_v11 = vpop.f32.mrf.mxu3 }
 0x15b   : > { %v1280_v6 = vmul.f32 %v962_v18, %v3714_v23  ;;  %v1786_v16 = vsel %vm1785_vm5, %v2583_v10, %v1782_v51  ;;  %v1175_v50 = vsub.f32 1.0, %v1174_v5  ;;  %v1534_v20 = vsub.f32 0.0, %v3853_v17  ;;  %vm1180_vm7 = vmor %vm1178_vm3, %vm1179_vm6  ;;  %v1392_v18 = vpop.f32.mrf.mxu1 }
 0x15c   : > { %v1791_v15 = vsel %vm3831_vm12, %v1790_v0, %v1786_v16  ;;  %v2011_v38 = vand.u32 2147483647, %v3846_v31  ;;  %v2013_v55 = vand.u32 2147483648, %v3846_v31  ;;  %2588 = vpow2.f32 %v747_v46  ;;  %v611_v46 = vpop.f32.mrf.mxu2 }
 0x15d   : > { %1312 = vst.msk [vmem:[%s3025_s27 + $0x48] sm:$0xff] %vm409_vm1, %v1280_v6  ;;  %v2109_v27 = vmul.f32 %v1791_v15, %v3717_v26  ;;  %v1176_v23 = vmul.f32 %v2585_v43, %v1175_v50  ;;  %v1576_v58 = vmul.f32 1.442695, %v1534_v20  ;;  %v653_v19 = vmul.f32 %v3453_v41, %v3820_v48 }
 0x15e   : > { %v2587_v29 = vpop.eup %2586  ;;  %v1482_v47 = vmul.f32 %v3459_v12, %v1434_v52  ;;  %v638_v56 = vmul.f32 %v3453_v41, %v560_v21  ;;  %v1467_v62 = vmul.f32 %v3459_v12, %v1389_v35  ;;  %v654_v34 = vmul.f32 %v3453_v41, %v608_v49 }
 0x15f   : > { %2141 = vst.msk [vmem:[%s3035_s11 + $0x48] sm:$0xff] %vm409_vm1, %v2109_v27  ;;  %v1177_v10 = vadd.f32 %v2585_v43, %v1176_v23  ;;  %v2003_v26 = vmul.f32 %v2587_v29, %v3846_v31  ;;  %vm2008_vm8 = vweird.f32 %v2587_v29  ;;  %2590 = vpow2.f32 %v1576_v58  ;;  %v3952_v23 = vld [vmem:[%s4421_s2] ss:$0 sm:$0xff] }
 0x160   : > { %v3895_v48 = vadd.f32 %v3474_v61, %v653_v19  ;;  %v3898_v8 = vadd.f32 %v3482_v25, %v1482_v47  ;;  %v3901_v42 = vadd.f32 %v3474_v61, %v638_v56  ;;  %v3904_v13 = vadd.f32 %v3482_v25, %v1467_v62 }
 0x161   : > { %v1181_v59 = vsel %vm1180_vm7, %v2585_v43, %v1177_v10  ;;  %v2004_v37 = vsub.f32 1.0, %v2003_v26  ;;  %v3907_v32 = vadd.f32 %v3474_v61, %v654_v34  ;;  %v1483_v28 = vmul.f32 %v3459_v12, %v1437_v11  ;;  %v3968_v10 = vld [vmem:[%s4422_s3] ss:$0 sm:$0xff] }
 0x162   : > { %v2589_v39 = vpop.eup %2588  ;;  %v1186_v44 = vsel %vm3862_vm4, %v1185_v30, %v1181_v59  ;;  %v721_v45 = vsub.f32 0.0, %v3895_v48  ;;  %v1550_v4 = vsub.f32 0.0, %v3898_v8  ;;  %v706_v9 = vsub.f32 0.0, %v3901_v42  ;;  %v3976_v59 = vld [vmem:[%s4425_s6] ss:$0 sm:$0xff] }
 0x163   : > { %v1296_v52 = vmul.f32 %v1186_v44, %v3720_v2  ;;  %v2005_v14 = vmul.f32 %v2587_v29, %v2004_v37  ;;  %v3916_v22 = vadd.f32 1.0, %v2589_v39  ;;  %v1535_v61 = vsub.f32 0.0, %v3904_v13  ;;  %v1440_v44 = vpop.f32.mrf.mxu3 }
 0x164   : > { %vm2007_vm9 = vweird.f32 %v3846_v31  ;;  %v779_v60 = vmul.f32 1.442695, %v721_v45  ;;  %v1608_v63 = vmul.f32 1.442695, %v1550_v4  ;;  %v2014_v36 = vor.u32 1.1754944e-38, %v2013_v55 }
 0x165   : > { %v2591_v33 = vpop.eup %2590  ;;  %1328 = vst.msk [vmem:[%s3025_s27 + $0xc8] sm:$0xff] %vm409_vm1, %v1296_v52  ;;  %v2006_v24 = vadd.f32 %v2587_v29, %v2005_v14  ;;  %2592 = vrcp.f32 %v3916_v22  ;;  %v749_v57 = vmul.f32 1.442695, %v706_v9  ;;  %vm2009_vm10 = vmor %vm2007_vm9, %vm2008_vm8  ;;  %v1578_v3 = vmul.f32 1.442695, %v1535_v61 }
 0x166   : > { %v3924_v2 = vadd.f32 1.0, %v2591_v33  ;;  %2594 = vpow2.f32 %v779_v60  ;;  %v3927_v43 = vadd.f32 %v3482_v25, %v1483_v28  ;;  %vm2012_vm11 = vcmp.eq.f32.partialorder %v2011_v38, 8.507059e+37 }
 0x167   : > { %v2010_v31 = vsel %vm2009_vm10, %v2587_v29, %v2006_v24  ;;  %2596 = vpow2.f32 %v1608_v63  ;;  %v722_v53 = vsub.f32 0.0, %v3907_v32  ;;  %v972_v1 = vand.u32 2147483647, %v3916_v22 }
 0x168   : > { %v2015_v0 = vsel %vm2012_vm11, %v2014_v36, %v2010_v31  ;;  %2598 = vrcp.f32 %v3924_v2  ;;  %v974_v5 = vand.u32 2147483648, %v3916_v22  ;;  %v1551_v30 = vsub.f32 0.0, %v3927_v43  ;;  %v4000_v36 = vld [vmem:[%s4424_s5] ss:$0 sm:$0xff] }
 0x169   : > { %v2125_v51 = vmul.f32 %v2015_v0, %v3735_v7  ;;  %2600 = vpow2.f32 %v749_v57  ;;  %v781_v25 = vmul.f32 1.442695, %v722_v53  ;;  %vm968_vm14 = vweird.f32 %v3916_v22 }
 0x16a   : > { %2602 = vpow2.f32 %v1578_v3  ;;  %v1801_v6 = vand.u32 2147483647, %v3924_v2  ;;  %v1803_v16 = vand.u32 2147483648, %v3924_v2  ;;  %vm3941_vm12 = vcmp.eq.f32.partialorder %v972_v1, 8.507059e+37 }
 0x16b   : > { %v2593_v21 = vpop.eup %2592  ;;  %2157 = vst.msk [vmem:[%s3035_s11 + $0xc8] sm:$0xff] %vm409_vm1, %v2125_v51  ;;  %v639_v35 = vmul.f32 %v3453_v41, %v563_v54  ;;  %v1468_v49 = vmul.f32 %v3459_v12, %v1392_v18  ;;  %v975_v38 = vor.u32 1.1754944e-38, %v974_v5  ;;  %v1610_v27 = vmul.f32 1.442695, %v1551_v30 }
 0x16c   : > { %v2595_v7 = vpop.eup %2594  ;;  %v964_v50 = vmul.f32 %v2593_v21, %v3916_v22  ;;  %v655_v58 = vmul.f32 %v3952_v23, %v611_v46  ;;  %vm1797_vm13 = vweird.f32 %v3924_v2  ;;  %2604 = vpow2.f32 %v781_v25 }
 0x16d   : > { %v2597_v15 = vpop.eup %2596  ;;  %v3947_v55 = vadd.f32 1.0, %v2595_v7  ;;  %vm969_vm15 = vweird.f32 %v2593_v21  ;;  %vm3959_vm0 = vcmp.eq.f32.partialorder %v1801_v6, 8.507059e+37  ;;  %v1804_v62 = vor.u32 1.1754944e-38, %v1803_v16 }
 0x16e   : > { %v2599_v19 = vpop.eup %2598  ;;  %v965_v29 = vsub.f32 1.0, %v964_v50  ;;  %v3956_v47 = vadd.f32 1.0, %v2597_v15  ;;  %v3971_v26 = vadd.f32 %v3968_v10, %v639_v35  ;;  %v3979_v37 = vadd.f32 %v3976_v59, %v1468_v49  ;;  %vm970_vm3 = vmor %vm968_vm14, %vm969_vm15 }
 0x16f   : > { %v2601_v41 = vpop.eup %2600  ;;  %v1793_v12 = vmul.f32 %v2599_v19, %v3924_v2  ;;  %2606 = vrcp.f32 %v3947_v55  ;;  %vm1798_vm2 = vweird.f32 %v2599_v19  ;;  %v3982_v39 = vadd.f32 %v3968_v10, %v655_v58 }
 0x170   : > { %v2603_v34 = vpop.eup %2602  ;;  %v966_v11 = vmul.f32 %v2593_v21, %v965_v29  ;;  %2608 = vrcp.f32 %v3956_v47  ;;  %v1196_v4 = vand.u32 2147483647, %v3947_v55  ;;  %v1198_v9 = vand.u32 2147483648, %v3947_v55  ;;  %vm1799_vm6 = vmor %vm1797_vm13, %vm1798_vm2 }
 0x171   : > { %v1794_v28 = vsub.f32 1.0, %v1793_v12  ;;  %2610 = vpow2.f32 %v1610_v27  ;;  %v3986_v52 = vadd.f32 1.0, %v2601_v41  ;;  %v2025_v61 = vand.u32 2147483647, %v3956_v47 }
 0x172   : > { %v967_v45 = vadd.f32 %v2593_v21, %v966_v11  ;;  %v2027_v60 = vand.u32 2147483648, %v3956_v47  ;;  %v3993_v63 = vadd.f32 1.0, %v2603_v34  ;;  %v2605_v33 = vpop.eup %2604  ;;  %vm1192_vm4 = vweird.f32 %v3947_v55 }
 0x173   : > { %v1795_v14 = vmul.f32 %v2599_v19, %v1794_v28  ;;  %2612 = vrcp.f32 %v3986_v52  ;;  %v4003_v22 = vmul.f32 %v4000_v36, %v1440_v44  ;;  %vm2021_vm5 = vweird.f32 %v3956_v47 }
 0x174   : > { %v971_v24 = vsel %vm970_vm3, %v2593_v21, %v967_v45  ;;  %2614 = vrcp.f32 %v3993_v63  ;;  %vm4014_vm8 = vcmp.eq.f32.partialorder %v1196_v4, 8.507059e+37  ;;  %v1199_v5 = vor.u32 1.1754944e-38, %v1198_v9 }
 0x175   : > { %v2607_v57 = vpop.eup %2606  ;;  %v976_v3 = vsel %vm3941_vm12, %v975_v38, %v971_v24  ;;  %v1796_v31 = vadd.f32 %v2599_v19, %v1795_v14  ;;  %v988_v54 = vand.u32 2147483648, %v3986_v52  ;;  %vm4020_vm7 = vcmp.eq.f32.partialorder %v2025_v61, 8.507059e+37 }
 0x176   : > { %v2609_v53 = vpop.eup %2608  ;;  %v1281_v0 = vmul.f32 %v976_v3, %v3760_v40  ;;  %v1188_v1 = vmul.f32 %v2607_v57, %v3947_v55  ;;  %v2028_v40 = vor.u32 1.1754944e-38, %v2027_v60  ;;  %v986_v2 = vand.u32 2147483647, %v3986_v52 }
 0x177   : > { %v2611_v18 = vpop.eup %2610  ;;  %v1800_v25 = vsel %vm1799_vm6, %v2599_v19, %v1796_v31  ;;  %v2017_v30 = vmul.f32 %v2609_v53, %v3956_v47  ;;  %vm982_vm9 = vweird.f32 %v3986_v52  ;;  %v1815_v16 = vand.u32 2147483647, %v3993_v63 }
 0x178   : > { %1313 = vst.msk [vmem:[%s3025_s27 + $0x50] sm:$0xff] %vm409_vm1, %v1281_v0  ;;  %v1805_v21 = vsel %vm3959_vm0, %v1804_v62, %v1800_v25  ;;  %v1189_v6 = vsub.f32 1.0, %v1188_v1  ;;  %vm1193_vm10 = vweird.f32 %v2607_v57  ;;  %v4032_v20 = vadd.f32 1.0, %v2605_v33 }
 0x179   : > { %v2110_v7 = vmul.f32 %v1805_v21, %v3853_v17  ;;  %v2018_v50 = vsub.f32 1.0, %v2017_v30  ;;  %v2613_v35 = vpop.eup %2612  ;;  %vm2022_vm11 = vweird.f32 %v2609_v53  ;;  %v989_v15 = vor.u32 1.1754944e-38, %v988_v54  ;;  %vm1194_vm15 = vmor %vm1192_vm4, %vm1193_vm10  ;;  %v1395_v21 = vpop.f32.mrf.mxu1 }
 0x17a   : > { %v1190_v49 = vmul.f32 %v2607_v57, %v1189_v6  ;;  %v4034_v38 = vadd.f32 1.0, %v2611_v18  ;;  %v2615_v27 = vpop.eup %2614  ;;  %v978_v19 = vmul.f32 %v2613_v35, %v3986_v52  ;;  %vm4039_vm14 = vcmp.eq.f32.partialorder %v986_v2, 8.507059e+37  ;;  %vm2023_vm2 = vmor %vm2021_vm5, %vm2022_vm11  ;;  %v614_v6 = vpop.f32.mrf.mxu2 }
 0x17b   : > { %2142 = vst.msk [vmem:[%s3035_s11 + $0x50] sm:$0xff] %vm409_vm1, %v2110_v7  ;;  %v2019_v58 = vmul.f32 %v2609_v53, %v2018_v50  ;;  %vm1811_vm12 = vweird.f32 %v3993_v63  ;;  %v1817_v17 = vand.u32 2147483648, %v3993_v63  ;;  %v1807_v12 = vmul.f32 %v2615_v27, %v3993_v63  ;;  %v566_v63 = vpop.f32.mrf.mxu0 }
 0x17c   : > { %v1191_v41 = vadd.f32 %v2607_v57, %v1190_v49  ;;  %vm4046_vm13 = vcmp.eq.f32.partialorder %v1815_v16, 8.507059e+37  ;;  %2616 = vrcp.f32 %v4032_v20  ;;  %v979_v34 = vsub.f32 1.0, %v978_v19 }
 0x17d   : > { %v2020_v62 = vadd.f32 %v2609_v53, %v2019_v58  ;;  %vm983_vm0 = vweird.f32 %v2613_v35  ;;  %v707_v11 = vsub.f32 0.0, %v3971_v26  ;;  %v1808_v44 = vsub.f32 1.0, %v1807_v12  ;;  %v1443_v12 = vpop.f32.mrf.mxu3 }
 0x17e   : > { %v1195_v28 = vsel %vm1194_vm15, %v2607_v57, %v1191_v41  ;;  %v1212_v45 = vand.u32 2147483648, %v4032_v20  ;;  %2618 = vrcp.f32 %v4034_v38  ;;  %v980_v9 = vmul.f32 %v2613_v35, %v979_v34  ;;  %vm984_vm5 = vmor %vm982_vm9, %vm983_vm0 }
 0x17f   : > { %v1200_v55 = vsel %vm4014_vm8, %v1199_v5, %v1195_v28  ;;  %v2024_v4 = vsel %vm2023_vm2, %v2609_v53, %v2020_v62  ;;  %v1210_v14 = vand.u32 2147483647, %v4032_v20  ;;  %v1809_v60 = vmul.f32 %v2615_v27, %v1808_v44 }
 0x180   : > { %v1297_v61 = vmul.f32 %v1200_v55, %v3895_v48  ;;  %v2029_v47 = vsel %vm4020_vm7, %v2028_v40, %v2024_v4  ;;  %vm1812_vm3 = vweird.f32 %v2615_v27  ;;  %v981_v24 = vadd.f32 %v2613_v35, %v980_v9 }
 0x181   : > { %v2126_v33 = vmul.f32 %v2029_v47, %v3898_v8  ;;  %v1818_v57 = vor.u32 1.1754944e-38, %v1817_v17  ;;  %vm1206_vm4 = vweird.f32 %v4032_v20  ;;  %v1810_v31 = vadd.f32 %v2615_v27, %v1809_v60  ;;  %vm1813_vm6 = vmor %vm1811_vm12, %vm1812_vm3 }
 0x182   : > { %v2617_v3 = vpop.eup %2616  ;;  %1329 = vst.msk [vmem:[%s3025_s27 + $0xd0] sm:$0xff] %vm409_vm1, %v1297_v61  ;;  %v1213_v48 = vor.u32 1.1754944e-38, %v1212_v45  ;;  %v751_v53 = vmul.f32 1.442695, %v707_v11  ;;  %v1536_v0 = vsub.f32 0.0, %v3979_v37  ;;  %v985_v1 = vsel %vm984_vm5, %v2613_v35, %v981_v24 }
 0x183   : > { %2158 = vst.msk [vmem:[%s3035_s11 + $0xd0] sm:$0xff] %vm409_vm1, %v2126_v33  ;;  %v1202_v8 = vmul.f32 %v2617_v3, %v4032_v20  ;;  %vm4079_vm8 = vcmp.eq.f32.partialorder %v1210_v14, 8.507059e+37  ;;  %vm2035_vm7 = vweird.f32 %v4034_v38  ;;  %v2039_v52 = vand.u32 2147483647, %v4034_v38 }
 0x184   : > { %v2041_v5 = vand.u32 2147483648, %v4034_v38  ;;  %v2619_v54 = vpop.eup %2618  ;;  %v990_v18 = vsel %vm4039_vm14, %v989_v15, %v985_v1  ;;  %v1814_v25 = vsel %vm1813_vm6, %v2615_v27, %v1810_v31  ;;  %vm1207_vm9 = vweird.f32 %v2617_v3  ;;  %v569_v1 = vpop.f32.mrf.mxu0 }
 0x185   : > { %2620 = vpow2.f32 %v751_v53  ;;  %v1282_v30 = vmul.f32 %v990_v18, %v3901_v42  ;;  %v1819_v46 = vsel %vm4046_vm13, %v1818_v57, %v1814_v25  ;;  %v1203_v40 = vsub.f32 1.0, %v1202_v8  ;;  %vm1208_vm11 = vmor %vm1206_vm4, %vm1207_vm9  ;;  %v1398_v8 = vpop.f32.mrf.mxu1 }
 0x186   : > { %v2031_v2 = vmul.f32 %v2619_v54, %v4034_v38  ;;  %v2111_v16 = vmul.f32 %v1819_v46, %v3904_v13  ;;  %vm2036_vm10 = vweird.f32 %v2619_v54  ;;  %v1580_v7 = vmul.f32 1.442695, %v1536_v0 }
 0x187   : > { %v723_v50 = vsub.f32 0.0, %v3982_v39  ;;  %1314 = vst.msk [vmem:[%s3025_s27 + $0x58] sm:$0xff] %vm409_vm1, %v1282_v30  ;;  %v1204_v35 = vmul.f32 %v2617_v3, %v1203_v40  ;;  %v4098_v42 = vadd.f32 %v3976_v59, %v4003_v22  ;;  %v640_v15 = vmul.f32 %v3952_v23, %v566_v63  ;;  %vm2037_vm14 = vmor %vm2035_vm7, %vm2036_vm10 }
 0x188   : > { %v2032_v49 = vsub.f32 1.0, %v2031_v2  ;;  %2143 = vst.msk [vmem:[%s3035_s11 + $0x58] sm:$0xff] %vm409_vm1, %v2111_v16  ;;  %2622 = vpow2.f32 %v1580_v7  ;;  %v1469_v13 = vmul.f32 %v4000_v36, %v1395_v21  ;;  %v656_v58 = vmul.f32 %v3952_v23, %v614_v6 }
 0x189   : > { %v783_v27 = vmul.f32 1.442695, %v723_v50  ;;  %v1205_v19 = vadd.f32 %v2617_v3, %v1204_v35  ;;  %v1552_v17 = vsub.f32 0.0, %v4098_v42  ;;  %v4107_v41 = vadd.f32 %v3968_v10, %v640_v15 }
 0x18a   : > { %v2033_v29 = vmul.f32 %v2619_v54, %v2032_v49  ;;  %v2042_v56 = vor.u32 1.1754944e-38, %v2041_v5  ;;  %v4113_v62 = vadd.f32 %v3976_v59, %v1469_v13  ;;  %v4116_v34 = vadd.f32 %v3968_v10, %v656_v58 }
 0x18b   : > { %v2621_v22 = vpop.eup %2620  ;;  %2624 = vpow2.f32 %v783_v27  ;;  %v1209_v11 = vsel %vm1208_vm11, %v2617_v3, %v1205_v19  ;;  %v1612_v45 = vmul.f32 1.442695, %v1552_v17  ;;  %v708_v20 = vsub.f32 0.0, %v4107_v41 }
 0x18c   : > { %v2034_v28 = vadd.f32 %v2619_v54, %v2033_v29  ;;  %v4118_v44 = vadd.f32 1.0, %v2621_v22  ;;  %v1214_v55 = vsel %vm4079_vm8, %v1213_v48, %v1209_v11  ;;  %v1537_v4 = vsub.f32 0.0, %v4113_v62 }
 0x18d   : > { %v1485_v9 = vmul.f32 %v4000_v36, %v1443_v12  ;;  %v1298_v14 = vmul.f32 %v1214_v55, %v3907_v32  ;;  %vm2040_vm12 = vcmp.eq.f32.partialorder %v2039_v52, 8.507059e+37  ;;  %v753_v24 = vmul.f32 1.442695, %v708_v20 }
 0x18e   : > { %v2038_v61 = vsel %vm2037_vm14, %v2619_v54, %v2034_v28  ;;  %2626 = vrcp.f32 %v4118_v44  ;;  %v2623_v47 = vpop.eup %2622  ;;  %v1582_v57 = vmul.f32 1.442695, %v1537_v4  ;;  %v724_v31 = vsub.f32 0.0, %v4116_v34 }
 0x18f   : > { %v2043_v60 = vsel %vm2040_vm12, %v2042_v56, %v2038_v61  ;;  %2628 = vpow2.f32 %v1612_v45  ;;  %1330 = vst.msk [vmem:[%s3025_s27 + $0xd8] sm:$0xff] %vm409_vm1, %v1298_v14  ;;  %v4133_v33 = vadd.f32 1.0, %v2623_v47  ;;  %v4137_v32 = vadd.f32 %v3976_v59, %v1485_v9 }
 0x190   : > { %v2127_v38 = vmul.f32 %v2043_v60, %v3927_v43  ;;  %v1000_v48 = vand.u32 2147483647, %v4118_v44  ;;  %v1002_v53 = vand.u32 2147483648, %v4118_v44  ;;  %vm996_vm13 = vweird.f32 %v4118_v44 }
 0x191   : > { %v2625_v3 = vpop.eup %2624  ;;  %2630 = vrcp.f32 %v4133_v33  ;;  %v1553_v43 = vsub.f32 0.0, %v4137_v32  ;;  %v1831_v52 = vand.u32 2147483648, %v4133_v33  ;;  %v1829_v18 = vand.u32 2147483647, %v4133_v33 }
 0x192   : > { %2159 = vst.msk [vmem:[%s3035_s11 + $0xd8] sm:$0xff] %vm409_vm1, %v2127_v38  ;;  %v4144_v0 = vadd.f32 1.0, %v2625_v3  ;;  %2632 = vpow2.f32 %v753_v24  ;;  %v785_v25 = vmul.f32 1.442695, %v724_v31  ;;  %vm4152_vm15 = vcmp.eq.f32.partialorder %v1000_v48, 8.507059e+37 }
 0x193   : > { %2634 = vpow2.f32 %v1582_v57  ;;  %v641_v46 = vmul.f32 %v3952_v23, %v569_v1  ;;  %v1470_v40 = vmul.f32 %v4000_v36, %v1398_v8  ;;  %v1003_v21 = vor.u32 1.1754944e-38, %v1002_v53 }
 0x194   : > { %v2627_v51 = vpop.eup %2626  ;;  %2636 = vrcp.f32 %v4144_v0  ;;  %vm1825_vm0 = vweird.f32 %v4133_v33  ;;  %v1614_v6 = vmul.f32 1.442695, %v1553_v43  ;;  %v1832_v7 = vor.u32 1.1754944e-38, %v1831_v52 }
 0x195   : > { %v2629_v5 = vpop.eup %2628  ;;  %v992_v54 = vmul.f32 %v2627_v51, %v4118_v44  ;;  %v1224_v50 = vand.u32 2147483647, %v4144_v0  ;;  %v1226_v35 = vand.u32 2147483648, %v4144_v0  ;;  %vm997_vm2 = vweird.f32 %v2627_v51 }
 0x196   : > { %v4156_v30 = vadd.f32 1.0, %v2629_v5  ;;  %vm4165_vm3 = vcmp.eq.f32.partialorder %v1829_v18, 8.507059e+37  ;;  %vm1220_vm4 = vweird.f32 %v4144_v0  ;;  %v4173_v29 = vadd.f32 %v3968_v10, %v641_v46  ;;  %vm998_vm5 = vmor %vm996_vm13, %vm997_vm2 }
 0x197   : > { %v993_v2 = vsub.f32 1.0, %v992_v54  ;;  %v2631_v16 = vpop.eup %2630  ;;  %v4176_v17 = vadd.f32 %v3976_v59, %v1470_v40  ;;  %vm4183_vm6 = vcmp.eq.f32.partialorder %v1224_v50, 8.507059e+37  ;;  %v1227_v55 = vor.u32 1.1754944e-38, %v1226_v35  ;;  %v617_v35 = vpop.f32.mrf.mxu2 }
 0x198   : > { %2638 = vrcp.f32 %v4156_v30  ;;  %v2633_v49 = vpop.eup %2632  ;;  %v1821_v27 = vmul.f32 %v2631_v16, %v4133_v33  ;;  %v2053_v20 = vand.u32 2147483647, %v4156_v30  ;;  %vm1826_vm8 = vweird.f32 %v2631_v16 }
 0x199   : > { %v994_v15 = vmul.f32 %v2627_v51, %v993_v2  ;;  %2640 = vpow2.f32 %v785_v25  ;;  %v2635_v58 = vpop.eup %2634  ;;  %v4170_v19 = vadd.f32 1.0, %v2633_v49  ;;  %vm2049_vm7 = vweird.f32 %v4156_v30  ;;  %vm1827_vm9 = vmor %vm1825_vm0, %vm1826_vm8 }
 0x19a   : > { %v2637_v12 = vpop.eup %2636  ;;  %v1822_v56 = vsub.f32 1.0, %v1821_v27  ;;  %v4178_v11 = vadd.f32 1.0, %v2635_v58  ;;  %2642 = vpow2.f32 %v1614_v6  ;;  %v2055_v14 = vand.u32 2147483648, %v4156_v30 }
 0x19b   : > { %v995_v22 = vadd.f32 %v2627_v51, %v994_v15  ;;  %v1216_v28 = vmul.f32 %v2637_v12, %v4144_v0  ;;  %2644 = vrcp.f32 %v4170_v19  ;;  %v1014_v60 = vand.u32 2147483647, %v4170_v19 }
 0x19c   : > { %v1823_v9 = vmul.f32 %v2631_v16, %v1822_v56  ;;  %2646 = vrcp.f32 %v4178_v11  ;;  %v1016_v31 = vand.u32 2147483648, %v4170_v19  ;;  %vm1221_vm10 = vweird.f32 %v2637_v12 }
 0x19d   : > { %v999_v4 = vsel %vm998_vm5, %v2627_v51, %v995_v22  ;;  %v1217_v47 = vsub.f32 1.0, %v1216_v28  ;;  %vm4200_vm11 = vcmp.eq.f32.partialorder %v2053_v20, 8.507059e+37  ;;  %v709_v43 = vsub.f32 0.0, %v4173_v29  ;;  %vm1222_vm13 = vmor %vm1220_vm4, %vm1221_vm10 }
 0x19e   : > { %v2639_v44 = vpop.eup %2638  ;;  %v1004_v61 = vsel %vm4152_vm15, %v1003_v21, %v999_v4  ;;  %v1824_v57 = vadd.f32 %v2631_v16, %v1823_v9  ;;  %v2056_v51 = vor.u32 1.1754944e-38, %v2055_v14  ;;  %vm1010_vm14 = vweird.f32 %v4170_v19 }
 0x19f   : > { %v2641_v38 = vpop.eup %2640  ;;  %v1283_v24 = vmul.f32 %v1004_v61, %v3971_v26  ;;  %v2045_v3 = vmul.f32 %v2639_v44, %v4156_v30  ;;  %v1218_v48 = vmul.f32 %v2637_v12, %v1217_v47  ;;  %vm2050_vm12 = vweird.f32 %v2639_v44 }
 0x1a0   : > { %v2643_v1 = vpop.eup %2642  ;;  %v1828_v26 = vsel %vm1827_vm9, %v2631_v16, %v1824_v57  ;;  %v4210_v54 = vadd.f32 1.0, %v2641_v38  ;;  %vm4217_vm15 = vcmp.eq.f32.partialorder %v1014_v60, 8.507059e+37  ;;  %v1017_v40 = vor.u32 1.1754944e-38, %v1016_v31  ;;  %vm2051_vm0 = vmor %vm2049_vm7, %vm2050_vm12  ;;  %v1446_v60 = vpop.f32.mrf.mxu3 }
 0x1a1   : > { %1315 = vst.msk [vmem:[%s3025_s27 + $0x60] sm:$0xff] %vm409_vm1, %v1283_v24  ;;  %v2046_v8 = vsub.f32 1.0, %v2045_v3  ;;  %v2645_v52 = vpop.eup %2644  ;;  %v1833_v33 = vsel %vm4165_vm3, %v1832_v7, %v1828_v26  ;;  %v1219_v5 = vadd.f32 %v2637_v12, %v1218_v48  ;;  %v1843_v6 = vand.u32 2147483647, %v4178_v11 }
 0x1a2   : > { %v2112_v18 = vmul.f32 %v1833_v33, %v3979_v37  ;;  %v1006_v63 = vmul.f32 %v2645_v52, %v4170_v19  ;;  %v2647_v2 = vpop.eup %2646  ;;  %2648 = vrcp.f32 %v4210_v54  ;;  %v4223_v16 = vadd.f32 1.0, %v2643_v1  ;;  %v572_v19 = vpop.f32.mrf.mxu0 }
 0x1a3   : > { %v2047_v25 = vmul.f32 %v2639_v44, %v2046_v8  ;;  %v1223_v21 = vsel %vm1222_vm13, %v2637_v12, %v1219_v5  ;;  %v1835_v50 = vmul.f32 %v2647_v2, %v4178_v11  ;;  %vm1011_vm2 = vweird.f32 %v2645_v52  ;;  %v620_v5 = vpop.f32.mrf.mxu2 }
 0x1a4   : > { %2144 = vst.msk [vmem:[%s3035_s11 + $0x60] sm:$0xff] %vm409_vm1, %v2112_v18  ;;  %v1228_v37 = vsel %vm4183_vm6, %v1227_v55, %v1223_v21  ;;  %v1007_v7 = vsub.f32 1.0, %v1006_v63  ;;  %v1845_v15 = vand.u32 2147483648, %v4178_v11  ;;  %v1238_v27 = vand.u32 2147483647, %v4210_v54  ;;  %vm1012_vm6 = vmor %vm1010_vm14, %vm1011_vm2 }
 0x1a5   : > { %v2048_v0 = vadd.f32 %v2639_v44, %v2047_v25  ;;  %v1299_v49 = vmul.f32 %v1228_v37, %v3982_v39  ;;  %v1836_v12 = vsub.f32 1.0, %v1835_v50  ;;  %v1240_v22 = vand.u32 2147483648, %v4210_v54 }
 0x1a6   : > { %v1008_v58 = vmul.f32 %v2645_v52, %v1007_v7  ;;  %vm1839_vm3 = vweird.f32 %v4178_v11  ;;  %vm4242_vm4 = vcmp.eq.f32.partialorder %v1843_v6, 8.507059e+37  ;;  %2650 = vrcp.f32 %v4223_v16 }
 0x1a7   : > { %v2052_v13 = vsel %vm2051_vm0, %v2639_v44, %v2048_v0  ;;  %1331 = vst.msk [vmem:[%s3025_s27 + $0xe0] sm:$0xff] %vm409_vm1, %v1299_v49  ;;  %v1837_v45 = vmul.f32 %v2647_v2, %v1836_v12  ;;  %vm1840_vm5 = vweird.f32 %v2647_v2  ;;  %v1846_v20 = vor.u32 1.1754944e-38, %v1845_v15 }
 0x1a8   : > { %v2057_v39 = vsel %vm4200_vm11, %v2056_v51, %v2052_v13  ;;  %v1009_v28 = vadd.f32 %v2645_v52, %v1008_v58  ;;  %v2649_v55 = vpop.eup %2648  ;;  %vm1234_vm8 = vweird.f32 %v4210_v54  ;;  %v755_v4 = vmul.f32 1.442695, %v709_v43  ;;  %vm1841_vm9 = vmor %vm1839_vm3, %vm1840_vm5  ;;  %v1401_v51 = vpop.f32.mrf.mxu1 }
 0x1a9   : > { %v2128_v56 = vmul.f32 %v2057_v39, %v4098_v42  ;;  %v1538_v9 = vsub.f32 0.0, %v4176_v17  ;;  %v1838_v44 = vadd.f32 %v2647_v2, %v1837_v45  ;;  %v1230_v42 = vmul.f32 %v2649_v55, %v4210_v54 }
 0x1aa   : > { %v1013_v14 = vsel %vm1012_vm6, %v2645_v52, %v1009_v28  ;;  %vm4256_vm7 = vcmp.eq.f32.partialorder %v1238_v27, 8.507059e+37  ;;  %v1241_v47 = vor.u32 1.1754944e-38, %v1240_v22  ;;  %v2067_v24 = vand.u32 2147483647, %v4223_v16  ;;  %v1449_v28 = vpop.f32.mrf.mxu3 }
 0x1ab   : > { %2160 = vst.msk [vmem:[%s3035_s11 + $0xe0] sm:$0xff] %vm409_vm1, %v2128_v56  ;;  %v1018_v38 = vsel %vm4217_vm15, %v1017_v40, %v1013_v14  ;;  %v2069_v57 = vand.u32 2147483648, %v4223_v16  ;;  %2652 = vpow2.f32 %v755_v4  ;;  %v1842_v31 = vsel %vm1841_vm9, %v2647_v2, %v1838_v44 }
 0x1ac   : > { %v1284_v3 = vmul.f32 %v1018_v38, %v4107_v41  ;;  %v1231_v48 = vsub.f32 1.0, %v1230_v42  ;;  %v1584_v53 = vmul.f32 1.442695, %v1538_v9  ;;  %v2651_v43 = vpop.eup %2650  ;;  %v1847_v1 = vsel %vm4242_vm4, %v1846_v20, %v1842_v31 }
 0x1ad   : > { %v657_v26 = vmul.f32 %v3952_v23, %v617_v35  ;;  %v1486_v11 = vmul.f32 %v4000_v36, %v1446_v60  ;;  %v642_v8 = vmul.f32 %v3952_v23, %v572_v19  ;;  %v2113_v52 = vmul.f32 %v1847_v1, %v4113_v62 }
 0x1ae   : > { %1316 = vst.msk [vmem:[%s3025_s27 + $0x68] sm:$0xff] %vm409_vm1, %v1284_v3  ;;  %v1232_v41 = vmul.f32 %v2649_v55, %v1231_v48  ;;  %vm1235_vm10 = vweird.f32 %v2649_v55  ;;  %v2059_v33 = vmul.f32 %v2651_v43, %v4223_v16  ;;  %2654 = vpow2.f32 %v1584_v53 }
 0x1af   : > { %v4278_v18 = vadd.f32 %v3968_v10, %v657_v26  ;;  %v4281_v25 = vadd.f32 %v3976_v59, %v1486_v11  ;;  %v4284_v63 = vadd.f32 %v3968_v10, %v642_v8  ;;  %2145 = vst.msk [vmem:[%s3035_s11 + $0x68] sm:$0xff] %vm409_vm1, %v2113_v52  ;;  %vm2064_vm11 = vweird.f32 %v2651_v43  ;;  %vm1236_vm14 = vmor %vm1234_vm8, %vm1235_vm10 }
 0x1b0   : > { %v1233_v46 = vadd.f32 %v2649_v55, %v1232_v41  ;;  %v2060_v40 = vsub.f32 1.0, %v2059_v33  ;;  %v1471_v62 = vmul.f32 %v4000_v36, %v1401_v51  ;;  %v658_v0 = vmul.f32 %v3952_v23, %v620_v5 }
 0x1b1   : > { %v2653_v2 = vpop.eup %2652  ;;  %v725_v21 = vsub.f32 0.0, %v4278_v18  ;;  %v1554_v6 = vsub.f32 0.0, %v4281_v25  ;;  %v710_v37 = vsub.f32 0.0, %v4284_v63  ;;  %vm2063_vm12 = vweird.f32 %v4223_v16 }
 0x1b2   : > { %v1237_v7 = vsel %vm1236_vm14, %v2649_v55, %v1233_v46  ;;  %v2061_v50 = vmul.f32 %v2651_v43, %v2060_v40  ;;  %v805_v35 = vadd.f32 1.0, %v2653_v2  ;;  %v4296_v49 = vadd.f32 %v3976_v59, %v1471_v62  ;;  %vm2065_vm13 = vmor %vm2063_vm12, %vm2064_vm11 }
 0x1b3   : > { %v1242_v15 = vsel %vm4256_vm7, %v1241_v47, %v1237_v7  ;;  %v787_v54 = vmul.f32 1.442695, %v725_v21  ;;  %v1616_v27 = vmul.f32 1.442695, %v1554_v6  ;;  %v757_v13 = vmul.f32 1.442695, %v710_v37 }
 0x1b4   : > { %v1300_v58 = vmul.f32 %v1242_v15, %v4116_v34  ;;  %v2062_v12 = vadd.f32 %v2651_v43, %v2061_v50  ;;  %2656 = vrcp.f32 %v805_v35  ;;  %v2655_v23 = vpop.eup %2654  ;;  %vm2068_vm15 = vcmp.eq.f32.partialorder %v2067_v24, 8.507059e+37 }
 0x1b5   : > { %v2070_v22 = vor.u32 1.1754944e-38, %v2069_v57  ;;  %2658 = vpow2.f32 %v787_v54  ;;  %v1539_v39 = vsub.f32 0.0, %v4296_v49  ;;  %v1634_v56 = vadd.f32 1.0, %v2655_v23 }
 0x1b6   : > { %1332 = vst.msk [vmem:[%s3025_s27 + $0xe8] sm:$0xff] %vm409_vm1, %v1300_v58  ;;  %v2066_v30 = vsel %vm2065_vm13, %v2651_v43, %v2062_v12  ;;  %2660 = vpow2.f32 %v1616_v27  ;;  %v4307_v34 = vadd.f32 %v3968_v10, %v658_v0  ;;  %v1487_v20 = vmul.f32 %v4000_v36, %v1449_v28 }
 0x1b7   : > { %v2071_v16 = vsel %vm2068_vm15, %v2070_v22, %v2066_v30  ;;  %2662 = vpow2.f32 %v757_v13  ;;  %v1586_v55 = vmul.f32 1.442695, %v1539_v39  ;;  %v1028_v10 = vand.u32 2147483647, %v805_v35 }
 0x1b8   : > { %v2129_v45 = vmul.f32 %v2071_v16, %v4137_v32  ;;  %2664 = vrcp.f32 %v1634_v56  ;;  %v726_v9 = vsub.f32 0.0, %v4307_v34  ;;  %v1030_v61 = vand.u32 2147483648, %v805_v35 }
 0x1b9   : > { %2666 = vpow2.f32 %v1586_v55  ;;  %v4319_v38 = vadd.f32 %v3976_v59, %v1487_v20  ;;  %vm1024_vm0 = vweird.f32 %v805_v35  ;;  %vm4323_vm3 = vcmp.eq.f32.partialorder %v1028_v10, 8.507059e+37 }
 0x1ba   : > { %v2657_v4 = vpop.eup %2656  ;;  %2161 = vst.msk [vmem:[%s3035_s11 + $0xe8] sm:$0xff] %vm409_vm1, %v2129_v45  ;;  %v789_v24 = vmul.f32 1.442695, %v726_v9  ;;  %v1031_v48 = vor.u32 1.1754944e-38, %v1030_v61  ;;  %v1857_v53 = vand.u32 2147483647, %v1634_v56  ;;  %vm1853_vm5 = vweird.f32 %v1634_v56 }
 0x1bb   : > { %v2659_v14 = vpop.eup %2658  ;;  %v1020_v44 = vmul.f32 %v2657_v4, %v805_v35  ;;  %vm1025_vm2 = vweird.f32 %v2657_v4  ;;  %v1859_v43 = vand.u32 2147483648, %v1634_v56  ;;  %v1555_v8 = vsub.f32 0.0, %v4319_v38 }
 0x1bc   : > { %v2661_v42 = vpop.eup %2660  ;;  %v4314_v47 = vadd.f32 1.0, %v2659_v14  ;;  %vm1026_vm4 = vmor %vm1024_vm0, %vm1025_vm2  ;;  %vm4337_vm8 = vcmp.eq.f32.partialorder %v1857_v53, 8.507059e+37 }
 0x1bd   : > { %v2663_v60 = vpop.eup %2662  ;;  %v1021_v19 = vsub.f32 1.0, %v1020_v44  ;;  %v4316_v32 = vadd.f32 1.0, %v2661_v42  ;;  %v1860_v62 = vor.u32 1.1754944e-38, %v1859_v43  ;;  %v1618_v0 = vmul.f32 1.442695, %v1555_v8 }
 0x1be   : > { %v2665_v36 = vpop.eup %2664  ;;  %2668 = vrcp.f32 %v4314_v47  ;;  %v4327_v11 = vadd.f32 1.0, %v2663_v60  ;;  %v1252_v51 = vand.u32 2147483647, %v4314_v47  ;;  %vm1248_vm9 = vweird.f32 %v4314_v47 }
 0x1bf   : > { %v1022_v57 = vmul.f32 %v2657_v4, %v1021_v19  ;;  %v1849_v3 = vmul.f32 %v2665_v36, %v1634_v56  ;;  %2670 = vrcp.f32 %v4316_v32  ;;  %v2667_v1 = vpop.eup %2666  ;;  %vm1854_vm6 = vweird.f32 %v2665_v36 }
 0x1c0   : > { %2672 = vpow2.f32 %v789_v24  ;;  %v4333_v33 = vadd.f32 1.0, %v2667_v1  ;;  %vm1855_vm7 = vmor %vm1853_vm5, %vm1854_vm6  ;;  %vm4346_vm10 = vcmp.eq.f32.partialorder %v1252_v51, 8.507059e+37  ;;  %v1254_v50 = vand.u32 2147483648, %v4314_v47 }
 0x1c1   : > { %v1023_v59 = vadd.f32 %v2657_v4, %v1022_v57  ;;  %v1850_v26 = vsub.f32 1.0, %v1849_v3  ;;  %2674 = vrcp.f32 %v4327_v11  ;;  %v2081_v54 = vand.u32 2147483647, %v4316_v32 }
 0x1c2   : > { %2676 = vrcp.f32 %v4333_v33  ;;  %v2083_v12 = vand.u32 2147483648, %v4316_v32  ;;  %v1255_v56 = vor.u32 1.1754944e-38, %v1254_v50  ;;  %vm2077_vm12 = vweird.f32 %v4316_v32 }
 0x1c3   : > { %v1027_v52 = vsel %vm1026_vm4, %v2657_v4, %v1023_v59  ;;  %v1851_v41 = vmul.f32 %v2665_v36, %v1850_v26  ;;  %2678 = vpow2.f32 %v1618_v0  ;;  %v1042_v55 = vand.u32 2147483647, %v4327_v11 }
 0x1c4   : > { %v2669_v5 = vpop.eup %2668  ;;  %v1032_v46 = vsel %vm4323_vm3, %v1031_v48, %v1027_v52  ;;  %vm2082_vm15 = vcmp.eq.f32.partialorder %v2081_v54, 8.507059e+37  ;;  %v1044_v4 = vand.u32 2147483648, %v4327_v11  ;;  %v2084_v44 = vor.u32 1.1754944e-38, %v2083_v12 }
 0x1c5   : > { %v2671_v2 = vpop.eup %2670  ;;  %v1285_v21 = vmul.f32 %v1032_v46, %v4173_v29  ;;  %v1852_v6 = vadd.f32 %v2665_v36, %v1851_v41  ;;  %v1244_v37 = vmul.f32 %v2669_v5, %v4314_v47  ;;  %vm1249_vm11 = vweird.f32 %v2669_v5 }
 0x1c6   : > { %v2073_v35 = vmul.f32 %v2671_v2, %v4316_v32  ;;  %v2673_v27 = vpop.eup %2672  ;;  %vm2078_vm14 = vweird.f32 %v2671_v2  ;;  %vm1250_vm13 = vmor %vm1248_vm9, %vm1249_vm11  ;;  %vm1038_vm2 = vweird.f32 %v4327_v11  ;;  %vm4377_vm4 = vcmp.eq.f32.partialorder %v1042_v55, 8.507059e+37 }
 0x1c7   : > { %1317 = vst.msk [vmem:[%s3025_s27 + $0x70] sm:$0xff] %vm409_vm1, %v1285_v21  ;;  %v1856_v29 = vsel %vm1855_vm7, %v2665_v36, %v1852_v6  ;;  %v1245_v15 = vsub.f32 1.0, %v1244_v37  ;;  %v2675_v23 = vpop.eup %2674  ;;  %v4360_v30 = vadd.f32 1.0, %v2673_v27  ;;  %vm2079_vm0 = vmor %vm2077_vm12, %vm2078_vm14  ;;  %v1045_v3 = vor.u32 1.1754944e-38, %v1044_v4 }
 0x1c8   : > { %v1861_v13 = vsel %vm4337_vm8, %v1860_v62, %v1856_v29  ;;  %v2074_v58 = vsub.f32 1.0, %v2073_v35  ;;  %v1034_v16 = vmul.f32 %v2675_v23, %v4327_v11  ;;  %v2677_v9 = vpop.eup %2676  ;;  %vm1039_vm3 = vweird.f32 %v2675_v23 }
 0x1c9   : > { %v2114_v22 = vmul.f32 %v1861_v13, %v4176_v17  ;;  %v1246_v39 = vmul.f32 %v2669_v5, %v1245_v15  ;;  %2680 = vrcp.f32 %v4360_v30  ;;  %v1863_v47 = vmul.f32 %v2677_v9, %v4333_v33  ;;  %v2679_v60 = vpop.eup %2678  ;;  %vm1040_vm5 = vmor %vm1038_vm2, %vm1039_vm3 }
 0x1ca   : > { %v2075_v28 = vmul.f32 %v2671_v2, %v2074_v58  ;;  %v1035_v20 = vsub.f32 1.0, %v1034_v16  ;;  %vm1867_vm6 = vweird.f32 %v4333_v33  ;;  %v1873_v53 = vand.u32 2147483648, %v4333_v33 }
 0x1cb   : > { %2146 = vst.msk [vmem:[%s3035_s11 + $0x70] sm:$0xff] %vm409_vm1, %v2114_v22  ;;  %v1247_v45 = vadd.f32 %v2669_v5, %v1246_v39  ;;  %v1864_v31 = vsub.f32 1.0, %v1863_v47  ;;  %v1651_v43 = vadd.f32 1.0, %v2679_v60  ;;  %vm1868_vm8 = vweird.f32 %v2677_v9 }
 0x1cc   : > { %v2076_v17 = vadd.f32 %v2671_v2, %v2075_v28  ;;  %v1036_v61 = vmul.f32 %v2675_v23, %v1035_v20  ;;  %vm1869_vm7 = vmor %vm1867_vm6, %vm1868_vm8  ;;  %v1874_v52 = vor.u32 1.1754944e-38, %v1873_v53  ;;  %v1268_v41 = vand.u32 2147483648, %v4360_v30 }
 0x1cd   : > { %v1251_v14 = vsel %vm1250_vm13, %v2669_v5, %v1247_v45  ;;  %v1865_v1 = vmul.f32 %v2677_v9, %v1864_v31  ;;  %2682 = vrcp.f32 %v1651_v43  ;;  %v1266_v46 = vand.u32 2147483647, %v4360_v30 }
 0x1ce   : > { %v1256_v42 = vsel %vm4346_vm10, %v1255_v56, %v1251_v14  ;;  %v2080_v10 = vsel %vm2079_vm0, %v2671_v2, %v2076_v17  ;;  %v1037_v57 = vadd.f32 %v2675_v23, %v1036_v61  ;;  %vm1262_vm11 = vweird.f32 %v4360_v30 }
 0x1cf   : > { %v1301_v19 = vmul.f32 %v1256_v42, %v4278_v18  ;;  %v2085_v32 = vsel %vm2082_vm15, %v2084_v44, %v2080_v10  ;;  %v2681_v48 = vpop.eup %2680  ;;  %v1871_v18 = vand.u32 2147483647, %v4333_v33  ;;  %v1866_v8 = vadd.f32 %v2677_v9, %v1865_v1 }
 0x1d0   : > { %v2130_v24 = vmul.f32 %v2085_v32, %v4281_v25  ;;  %v1041_v25 = vsel %vm1040_vm5, %v2675_v23, %v1037_v57  ;;  %v1258_v59 = vmul.f32 %v2681_v48, %v4360_v30  ;;  %vm1263_vm10 = vweird.f32 %v2681_v48 }
 0x1d1   : > { %1333 = vst.msk [vmem:[%s3025_s27 + $0xf0] sm:$0xff] %vm409_vm1, %v1301_v19  ;;  %v1046_v26 = vsel %vm4377_vm4, %v1045_v3, %v1041_v25  ;;  %vm1872_vm9 = vcmp.eq.f32.partialorder %v1871_v18, 8.507059e+37  ;;  %v1870_v33 = vsel %vm1869_vm7, %v2677_v9, %v1866_v8  ;;  %vm1264_vm14 = vmor %vm1262_vm11, %vm1263_vm10  ;;  %v1269_v21 = vor.u32 1.1754944e-38, %v1268_v41 }
 0x1d2   : > { %2162 = vst.msk [vmem:[%s3035_s11 + $0xf0] sm:$0xff] %vm409_vm1, %v2130_v24  ;;  %v1286_v11 = vmul.f32 %v1046_v26, %v4284_v63  ;;  %v1259_v51 = vsub.f32 1.0, %v1258_v59  ;;  %v1875_v40 = vsel %vm1872_vm9, %v1874_v52, %v1870_v33  ;;  %vm1267_vm12 = vcmp.eq.f32.partialorder %v1266_v46, 8.507059e+37 }
 0x1d3   : > { %v2115_v62 = vmul.f32 %v1875_v40, %v4296_v49  ;;  %v2683_v2 = vpop.eup %2682  ;;  %v2097_v35 = vand.u32 2147483648, %v1651_v43  ;;  %v2095_v29 = vand.u32 2147483647, %v1651_v43  ;;  %vm2091_vm15 = vweird.f32 %v1651_v43 }
 0x1d4   : > { %1318 = vst.msk [vmem:[%s3025_s27 + $0x78] sm:$0xff] %vm409_vm1, %v1286_v11  ;;  %v1260_v5 = vmul.f32 %v2681_v48, %v1259_v51  ;;  %v2087_v37 = vmul.f32 %v2683_v2, %v1651_v43  ;;  %vm2092_vm13 = vweird.f32 %v2683_v2 }
 0x1d5   : > { %2147 = vst.msk [vmem:[%s3035_s11 + $0x78] sm:$0xff] %vm409_vm1, %v2115_v62  ;;  %vm2093_vm0 = vmor %vm2091_vm15, %vm2092_vm13  ;;  %v2098_v54 = vor.u32 1.1754944e-38, %v2097_v35  ;;  %vm2096_vm2 = vcmp.eq.f32.partialorder %v2095_v29, 8.507059e+37 }
 0x1d6   : > { %v1261_v63 = vadd.f32 %v2681_v48, %v1260_v5  ;;  %v2088_v50 = vsub.f32 1.0, %v2087_v37 }
 0x1d8   : > { %v1265_v6 = vsel %vm1264_vm14, %v2681_v48, %v1261_v63  ;;  %v2089_v49 = vmul.f32 %v2683_v2, %v2088_v50 }
 0x1d9   : > { %v1270_v0 = vsel %vm1267_vm12, %v1269_v21, %v1265_v6 }
 0x1da   : > { %v1302_v7 = vmul.f32 %v1270_v0, %v4307_v34  ;;  %v2090_v15 = vadd.f32 %v2683_v2, %v2089_v49 }
 0x1dc   : > { %1334 = vst.msk [vmem:[%s3025_s27 + $0xf8] sm:$0xff] %vm409_vm1, %v1302_v7  ;;  %v2094_v27 = vsel %vm2093_vm0, %v2683_v2, %v2090_v15 }
 0x1dd   : > { %v2099_v13 = vsel %vm2096_vm2, %v2098_v54, %v2094_v27 }
 0x1de   : > { %v2131_v58 = vmul.f32 %v2099_v13, %v4319_v38 }
 0x1e0   : > { %2163 = vst.msk [vmem:[%s3035_s11 + $0xf8] sm:$0xff] %vm409_vm1, %v2131_v58 }
 0x1e1 PF: > { %s19_s29 = sadd.s32 1, %s2714_s29   ;;  %s4534_s27 = smov %s2710_s28 }
 0x1e2   : > { %p16_p5 = scmp.ge.s32.totalorder %s19_s29, 4   ;;  %s4535_s28 = smov %s4537_s30 }
 0x1e4   :  { %18 = sbr.rel (!%p16_p5) target bundleno = 2 (0x2), region = 90 }

</bundles_post_ra>
